<compile_context>
chip_gen: v7x
topology: tpu7x:2x2x1
jax: 0.10.0
libtpu: 0.0.40
codegen_flags: <defaults>
</compile_context>

<pallas_src>
from functools import partial

import jax
import jax.numpy as jnp
from jax import lax
from jax.experimental import pallas as pl
from jax.experimental.pallas import tpu as pltpu


def _largest_tile(n, candidates):
    for c in candidates:
        if c <= n and n % c == 0:
            return c
    return n


def _vmem_capacity_bytes():
    try:
        cap = getattr(pltpu.get_tpu_info(), "vmem_capacity_bytes", None)
        if cap:
            return int(cap)
    except Exception:
        pass
    return 64 << 20   # conservative (v7x per-TC VMEM)


# ---------------------------------------------------------------------------
# Fused kernel: per-chunk input projection + LSTM recurrence + fc head.
# Grid = (batch_blocks "parallel", time_chunks "arbitrary"); h/c live in VMEM
# scratch across the time axis.
# ---------------------------------------------------------------------------
def _lstm_fused_kernel(x_ref, wih_ref, b_ref, whh_ref, w1_ref, b1_ref, w2_ref,
                       b2_ref, out_ref, xp_ref, h_ref, c_ref, *,
                       hidden_dim, t_chunk, unroll, gate_dtype):
    H = hidden_dim
    tb = pl.program_id(1)                      # time-chunk index ("arbitrary")

    @pl.when(tb == 0)
    def _init():
        h_ref[...] = jnp.zeros_like(h_ref)
        c_ref[...] = jnp.zeros_like(c_ref)

    # ---- fused input projection for this chunk (no dependence on h/c) ------
    # Static per-step MXU dots into VMEM scratch; the combined bias (with the
    # 0.5 sigmoid fold) is added here, so only the recurrent matmul sits on
    # the serial critical path below.
    wih = wih_ref[...]
    bias = b_ref[...]
    x_chunk = x_ref[...].astype(wih.dtype)     # one cast (bf16 on MXU path)
    for s in range(t_chunk):                   # static slices
        xp_ref[s] = (jnp.dot(x_chunk[s], wih,
                             preferred_element_type=jnp.float32) + bias)

    whh = whh_ref[...]                         # hoisted; bf16-resident

    def step(s, carry):
        h, c = carry
        gates = xp_ref[s] + jnp.dot(h.astype(whh.dtype), whh,
                                    preferred_element_type=jnp.float32)
        t_all = jnp.tanh(gates.astype(gate_dtype))   # one lane-dense EUP pass
        i = 0.5 * t_all[:, 0 * H:1 * H] + 0.5        # sigmoid(x)=0.5*tanh(x/2)+0.5
        f = 0.5 * t_all[:, 1 * H:2 * H] + 0.5        # (0.5 on x folded into W/b)
        g = t_all[:, 2 * H:3 * H]
        o = 0.5 * t_all[:, 3 * H:4 * H] + 0.5
        c_new = f * c + i * g                        # promotes to f32 (c is f32)
        h_new = o * jnp.tanh(c_new)
        return (h_new.astype(jnp.float32), c_new.astype(jnp.float32))

    h, c = lax.fori_loop(0, t_chunk, step, (h_ref[...], c_ref[...]),
                         unroll=unroll)
    h_ref[...] = h
    c_ref[...] = c

    @pl.when(tb == pl.num_programs(1) - 1)
    def _head():
        z = jnp.dot(h, w1_ref[...], preferred_element_type=jnp.float32) + b1_ref[...]
        z = jnp.maximum(z, 0.0)                                        # ReLU
        # fc2 as VPU multiply + lane reduction (avoids an N=1 MXU matmul).
        out_ref[...] = (jnp.sum(z * w2_ref[...], axis=-1, keepdims=True)
                        + b2_ref[...])


# ---------------------------------------------------------------------------
# Wrapper
# ---------------------------------------------------------------------------
def lstm_model_forward(x, params, *, mxu_dtype=jnp.bfloat16,
                       gate_dtype=jnp.float32):
    """x: (B, T, D) batch_first (PyTorch convention).  Returns (B, 1).

    mxu_dtype : dtype of MXU operands (x, W_ih, W_hh, h).  bfloat16 is native
                on every TPU generation's MXU (f32 is emulated, ~3x slower)
                and is the default; pass jnp.float32 for bit-tight checks.
    gate_dtype: dtype of the per-step tanh / gate elementwise math; f32 by
                default.  bfloat16 is a good knob on v6e/v7x (bf16 VPU/EUP);
                c/h state and the f*c + i*g accumulate stay f32 either way.
    """
    B, T, D = x.shape
    w_ih, w_hh, b_ih, b_hh, w1, b1, w2, b2 = params
    H = w_hh.shape[1]              # w_hh: (4H, H)
    F = w1.shape[0]                # fc1.weight: (F, H)
    G = 4 * H

    # ---- weight prep (right-multiply form; fold 0.5 into i/f/o columns) ----
    scale = jnp.concatenate([jnp.full((H,), 0.5), jnp.full((H,), 0.5),
                             jnp.ones((H,)), jnp.full((H,), 0.5)]).astype(jnp.float32)
    wih_t = (jnp.transpose(w_ih).astype(jnp.float32) * scale).astype(mxu_dtype)  # (D, 4H)
    whh_t = (jnp.transpose(w_hh).astype(jnp.float32) * scale).astype(mxu_dtype)  # (H, 4H)
    b = ((b_ih + b_hh).astype(jnp.float32) * scale).reshape(1, G)                # (1, 4H) f32
    w1_t = jnp.transpose(w1).astype(jnp.float32)                                 # (H, F)
    b1_r = b1.reshape(1, F).astype(jnp.float32)
    w2_r = w2.reshape(1, F).astype(jnp.float32)
    b2_r = b2.reshape(1, 1).astype(jnp.float32)

    # ---- pad batch to a sublane multiple; time-major (T, B_pad, D) ----------
    B_pad = max(8, -(-B // 8) * 8)
    x_tm = jnp.zeros((T, B_pad, D), jnp.float32).at[:, :B, :].set(
        jnp.transpose(x.astype(jnp.float32), (1, 0, 2)))

    # ---- tile selection (generation-aware VMEM budget) ----------------------
    vmem_cap = _vmem_capacity_bytes()
    mxu_bytes = 2 if mxu_dtype == jnp.bfloat16 else 4

    # >= 2 batch blocks whenever possible so v7x's 2 TensorCores both get work
    # via the "parallel" batch axis (no effect on single-TC v5e/v6e).
    bt_cap = B_pad if B_pad < 16 else max(8, (B_pad // 2) // 8 * 8)
    bt = _largest_tile(B_pad, tuple(c for c in (512, 256, 128, 64, 32, 16, 8)
                                    if c <= bt_cap))

    def est_vmem(tc):
        x_tile = 2 * tc * bt * D * 4                           # double-buffered x tile
        xp = tc * bt * G * 4                                   # xp scratch
        weights = 2 * ((D + H) * G * mxu_bytes
                       + (H * F + 2 * F + 1 + G) * 4)          # resident (dbl-buffered)
        state = 2 * bt * H * 4 + 2 * bt * 4                    # h/c scratch + out
        return x_tile + xp + weights + state

    t_cands = (32, 16, 8, 4, 2, 1)
    t_chunk = next(c for c in t_cands if T % c == 0)
    while t_chunk > 1 and est_vmem(t_chunk) > vmem_cap // 2:
        t_chunk = next(c for c in t_cands if c < t_chunk and T % c == 0)

    n_b, n_t = B_pad // bt, T // t_chunk

    # Register-pressure-aware unroll: steps are serially dependent through
    # (h, c); each live step holds a (bt, 4H) f32 gates tensor, so cap the
    # unroll when that would blow the 64x4KiB vreg file.
    unroll = int(max(1, min(t_chunk, 8 if bt * G * 4 <= (64 << 10) else 2)))

    vmem_limit = int(min(max(2 * est_vmem(t_chunk) + (1 << 20), 16 << 20),
                         int(vmem_cap * 0.9)))

    kernel = partial(_lstm_fused_kernel, hidden_dim=H, t_chunk=t_chunk,
                     unroll=unroll, gate_dtype=gate_dtype)

    # NOTE: h/c carry correctness requires the time axis to stay the innermost
    # grid dimension and be marked "arbitrary"; do not reorder the grid.
    out_pad = pl.pallas_call(
        kernel,
        out_shape=jax.ShapeDtypeStruct((B_pad, 1), jnp.float32),
        grid=(n_b, n_t),
        in_specs=[pl.BlockSpec((t_chunk, bt, D), lambda bi, ti: (ti, bi, 0)),  # x (time-major)
                  pl.BlockSpec((D, G), lambda bi, ti: (0, 0)),                 # W_ih'
                  pl.BlockSpec((1, G), lambda bi, ti: (0, 0)),                 # combined bias
                  pl.BlockSpec((H, G), lambda bi, ti: (0, 0)),                 # W_hh'
                  pl.BlockSpec((H, F), lambda bi, ti: (0, 0)),                 # fc1 W
                  pl.BlockSpec((1, F), lambda bi, ti: (0, 0)),                 # fc1 b
                  pl.BlockSpec((1, F), lambda bi, ti: (0, 0)),                 # fc2 W (row)
                  pl.BlockSpec((1, 1), lambda bi, ti: (0, 0))],                # fc2 b
        out_specs=pl.BlockSpec((bt, 1), lambda bi, ti: (bi, 0)),
        scratch_shapes=[pltpu.VMEM((t_chunk, bt, G), jnp.float32),   # per-chunk x_proj
                        pltpu.VMEM((bt, H), jnp.float32),            # h
                        pltpu.VMEM((bt, H), jnp.float32)],           # c
        compiler_params=pltpu.CompilerParams(
            dimension_semantics=("parallel", "arbitrary"),
            vmem_limit_bytes=vmem_limit),
    )(x_tm, wih_t, b, whh_t, w1_t, b1_r, w2_r, b2_r)

    return out_pad[:B]


# ---------------------------------------------------------------------------
# Params + pure-JAX reference (PyTorch LSTM semantics)
# ---------------------------------------------------------------------------
def init_params(key, input_dim, hidden_dim, fc_dim):
    ks = jax.random.split(key, 8)
    k_lstm = 1.0 / jnp.sqrt(hidden_dim)
    k_fc1 = 1.0 / jnp.sqrt(hidden_dim)
    k_fc2 = 1.0 / jnp.sqrt(fc_dim)
    u = lambda k, shape, s: jax.random.uniform(k, shape, jnp.float32, -s, s)
    w_ih = u(ks[0], (4 * hidden_dim, input_dim), k_lstm)
    w_hh = u(ks[1], (4 * hidden_dim, hidden_dim), k_lstm)
    b_ih = u(ks[2], (4 * hidden_dim,), k_lstm)
    b_hh = u(ks[3], (4 * hidden_dim,), k_lstm)
    w1 = u(ks[4], (fc_dim, hidden_dim), k_fc1)
    b1 = u(ks[5], (fc_dim,), k_fc1)
    w2 = u(ks[6], (1, fc_dim), k_fc2)
    b2 = u(ks[7], (1,), k_fc2)
    return (w_ih, w_hh, b_ih, b_hh, w1, b1, w2, b2)


def _reference_forward(x, params):
    w_ih, w_hh, b_ih, b_hh, w1, b1, w2, b2 = params
    B, T, D = x.shape
    H = w_hh.shape[1]
    h = jnp.zeros((B, H), jnp.float32)
    c = jnp.zeros((B, H), jnp.float32)
    for t in range(T):
        gates = x[:, t, :] @ w_ih.T + h @ w_hh.T + b_ih + b_hh
        i = jax.nn.sigmoid(gates[:, 0 * H:1 * H])
        f = jax.nn.sigmoid(gates[:, 1 * H:2 * H])
        g = jnp.tanh(gates[:, 2 * H:3 * H])
        o = jax.nn.sigmoid(gates[:, 3 * H:4 * H])
        c = f * c + i * g
        h = o * jnp.tanh(c)
    z = jnp.maximum(h @ w1.T + b1, 0.0)
    return z @ w2.T + b2


if __name__ == "__main__":
    B, T, D, H, F = 2, 8, 16, 32, 32
    key = jax.random.PRNGKey(0)
    k_x, k_p = jax.random.split(key)
    x = jax.random.normal(k_x, (B, T, D), jnp.float32)
    params = init_params(k_p, D, H, F)

    ref = _reference_forward(x, params)

    # Default path: bf16 MXU operands (native on v5e/v6e/v7x), f32 accumulate.
    out = jax.block_until_ready(lstm_model_forward(x, params))
    assert out.shape == (B, 1)
    assert jnp.allclose(out, ref, atol=5e-2, rtol=5e-2), (out, ref)

    # f32 MXU path: tight check against the f32 reference.
    out_f32 = jax.block_until_ready(
        lstm_model_forward(x, params, mxu_dtype=jnp.float32))
    assert jnp.allclose(out_f32, ref, atol=1e-4, rtol=1e-4), (out_f32, ref)

    print("KERNEL_OK")
</pallas_src>

<mosaic_0001>
module attributes {stable_mosaic.version = 11 : i64} {
  func.func @_lstm_fused_kernel(%arg0: i32, %arg1: i32, %arg2: memref<8x8x16xf32, #tpu.memory_space<vmem>>, %arg3: memref<16x128xbf16, #tpu.memory_space<vmem>>, %arg4: memref<1x128xf32, #tpu.memory_space<vmem>>, %arg5: memref<32x128xbf16, #tpu.memory_space<vmem>>, %arg6: memref<32x32xf32, #tpu.memory_space<vmem>>, %arg7: memref<1x32xf32, #tpu.memory_space<vmem>>, %arg8: memref<1x32xf32, #tpu.memory_space<vmem>>, %arg9: memref<1x1xf32, #tpu.memory_space<vmem>>, %arg10: memref<8x1xf32, #tpu.memory_space<vmem>>, %arg11: memref<8x8x128xf32, #tpu.memory_space<vmem>>, %arg12: memref<8x32xf32, #tpu.memory_space<vmem>>, %arg13: memref<8x32xf32, #tpu.memory_space<vmem>>) attributes {dimension_semantics = [#tpu.dimension_semantics<parallel>, #tpu.dimension_semantics<arbitrary>], iteration_bounds = array<i64: 1, 1>, scalar_prefetch = 0 : i64, scratch_operands = 3 : i64, tpu.core_type = #tpu.core_type<tc>, window_params = [{transform_indices = @transform_0, window_bounds = array<i64: 8, 8, 16>}, {pipeline_mode = #tpu.pipeline_mode<synchronous>, transform_indices = @transform_1, window_bounds = array<i64: 16, 128>}, {pipeline_mode = #tpu.pipeline_mode<synchronous>, transform_indices = @transform_2, window_bounds = array<i64: 1, 128>}, {pipeline_mode = #tpu.pipeline_mode<synchronous>, transform_indices = @transform_3, window_bounds = array<i64: 32, 128>}, {pipeline_mode = #tpu.pipeline_mode<synchronous>, transform_indices = @transform_4, window_bounds = array<i64: 32, 32>}, {pipeline_mode = #tpu.pipeline_mode<synchronous>, transform_indices = @transform_5, window_bounds = array<i64: 1, 32>}, {pipeline_mode = #tpu.pipeline_mode<synchronous>, transform_indices = @transform_6, window_bounds = array<i64: 1, 32>}, {pipeline_mode = #tpu.pipeline_mode<synchronous>, transform_indices = @transform_7, window_bounds = array<i64: 1, 1>}, {transform_indices = @transform_8, window_bounds = array<i64: 8, 1>}]} {
    %c0_i32 = arith.constant 0 : i32
    %0 = arith.cmpi eq, %arg1, %c0_i32 : i32
    %1 = arith.extui %0 : i1 to i32
    %c0_i32_0 = arith.constant 0 : i32
    %2 = arith.cmpi ne, %1, %c0_i32_0 : i32
    scf.if %2 {
      %cst_116 = arith.constant 0.000000e+00 : f32
      %303 = vector.broadcast %cst_116 : f32 to vector<8x32xf32>
      %c0_117 = arith.constant 0 : index
      %c0_118 = arith.constant 0 : index
      %304 = vector.load %arg12[%c0_117, %c0_118] : memref<8x32xf32, #tpu.memory_space<vmem>>, vector<8x32xf32>
      tpu.vector_store %arg12[%c0_117, %c0_118], %303 {strides = array<i32>} : memref<8x32xf32, #tpu.memory_space<vmem>>, vector<8x32xf32>,
      %cst_119 = arith.constant 0.000000e+00 : f32
      %305 = vector.broadcast %cst_119 : f32 to vector<8x32xf32>
      %c0_120 = arith.constant 0 : index
      %c0_121 = arith.constant 0 : index
      %306 = vector.load %arg13[%c0_120, %c0_121] : memref<8x32xf32, #tpu.memory_space<vmem>>, vector<8x32xf32>
      tpu.vector_store %arg13[%c0_120, %c0_121], %305 {strides = array<i32>} : memref<8x32xf32, #tpu.memory_space<vmem>>, vector<8x32xf32>,
    } else {
    }
    %c0 = arith.constant 0 : index
    %c0_1 = arith.constant 0 : index
    %3 = vector.load %arg3[%c0, %c0_1] : memref<16x128xbf16, #tpu.memory_space<vmem>>, vector<16x128xbf16>
    %c0_2 = arith.constant 0 : index
    %c0_3 = arith.constant 0 : index
    %4 = vector.load %arg4[%c0_2, %c0_3] : memref<1x128xf32, #tpu.memory_space<vmem>>, vector<1x128xf32>
    %c0_4 = arith.constant 0 : index
    %c0_5 = arith.constant 0 : index
    %c0_6 = arith.constant 0 : index
    %5 = vector.load %arg2[%c0_4, %c0_5, %c0_6] : memref<8x8x16xf32, #tpu.memory_space<vmem>>, vector<8x8x16xf32>
    %6 = arith.truncf %5 : vector<8x8x16xf32> to vector<8x8x16xbf16>
    %7 = vector.extract_strided_slice %6 {offsets = [0, 0, 0], sizes = [1, 8, 16], strides = [1, 1, 1]} : vector<8x8x16xbf16> to vector<1x8x16xbf16>
    %8 = vector.shape_cast %7 : vector<1x8x16xbf16> to vector<8x16xbf16>
    %cst = arith.constant dense<0.000000e+00> : vector<8x128xf32>
    %9 = tpu.matmul %8, %3, %cst {dimension_numbers = #tpu.dot_dimension_numbers<[1], [0], [0], [1], [0, 0, 1, 1], [], []>} : vector<8x16xbf16>, vector<16x128xbf16>, vector<8x128xf32> -> vector<8x128xf32>
    %10 = vector.broadcast %4 : vector<1x128xf32> to vector<8x128xf32>
    %11 = arith.addf %9, %10 : vector<8x128xf32>
    %c0_7 = arith.constant 0 : index
    %c0_8 = arith.constant 0 : index
    %c0_9 = arith.constant 0 : index
    %12 = vector.load %arg11[%c0_7, %c0_8, %c0_9] : memref<8x8x128xf32, #tpu.memory_space<vmem>>, vector<1x8x128xf32>
    %13 = vector.shape_cast %12 : vector<1x8x128xf32> to vector<8x128xf32>
    %14 = vector.shape_cast %11 : vector<8x128xf32> to vector<1x8x128xf32>
    tpu.vector_store %arg11[%c0_7, %c0_8, %c0_9], %14 {strides = array<i32>} : memref<8x8x128xf32, #tpu.memory_space<vmem>>, vector<1x8x128xf32>,
    %15 = vector.extract_strided_slice %6 {offsets = [1, 0, 0], sizes = [1, 8, 16], strides = [1, 1, 1]} : vector<8x8x16xbf16> to vector<1x8x16xbf16>
    %16 = vector.shape_cast %15 : vector<1x8x16xbf16> to vector<8x16xbf16>
    %cst_10 = arith.constant dense<0.000000e+00> : vector<8x128xf32>
    %17 = tpu.matmul %16, %3, %cst_10 {dimension_numbers = #tpu.dot_dimension_numbers<[1], [0], [0], [1], [0, 0, 1, 1], [], []>} : vector<8x16xbf16>, vector<16x128xbf16>, vector<8x128xf32> -> vector<8x128xf32>
    %18 = vector.broadcast %4 : vector<1x128xf32> to vector<8x128xf32>
    %19 = arith.addf %17, %18 : vector<8x128xf32>
    %c1 = arith.constant 1 : index
    %c0_11 = arith.constant 0 : index
    %c0_12 = arith.constant 0 : index
    %20 = vector.load %arg11[%c1, %c0_11, %c0_12] : memref<8x8x128xf32, #tpu.memory_space<vmem>>, vector<1x8x128xf32>
    %21 = vector.shape_cast %20 : vector<1x8x128xf32> to vector<8x128xf32>
    %22 = vector.shape_cast %19 : vector<8x128xf32> to vector<1x8x128xf32>
    tpu.vector_store %arg11[%c1, %c0_11, %c0_12], %22 {strides = array<i32>} : memref<8x8x128xf32, #tpu.memory_space<vmem>>, vector<1x8x128xf32>,
    %23 = vector.extract_strided_slice %6 {offsets = [2, 0, 0], sizes = [1, 8, 16], strides = [1, 1, 1]} : vector<8x8x16xbf16> to vector<1x8x16xbf16>
    %24 = vector.shape_cast %23 : vector<1x8x16xbf16> to vector<8x16xbf16>
    %cst_13 = arith.constant dense<0.000000e+00> : vector<8x128xf32>
    %25 = tpu.matmul %24, %3, %cst_13 {dimension_numbers = #tpu.dot_dimension_numbers<[1], [0], [0], [1], [0, 0, 1, 1], [], []>} : vector<8x16xbf16>, vector<16x128xbf16>, vector<8x128xf32> -> vector<8x128xf32>
    %26 = vector.broadcast %4 : vector<1x128xf32> to vector<8x128xf32>
    %27 = arith.addf %25, %26 : vector<8x128xf32>
    %c2 = arith.constant 2 : index
    %c0_14 = arith.constant 0 : index
    %c0_15 = arith.constant 0 : index
    %28 = vector.load %arg11[%c2, %c0_14, %c0_15] : memref<8x8x128xf32, #tpu.memory_space<vmem>>, vector<1x8x128xf32>
    %29 = vector.shape_cast %28 : vector<1x8x128xf32> to vector<8x128xf32>
    %30 = vector.shape_cast %27 : vector<8x128xf32> to vector<1x8x128xf32>
    tpu.vector_store %arg11[%c2, %c0_14, %c0_15], %30 {strides = array<i32>} : memref<8x8x128xf32, #tpu.memory_space<vmem>>, vector<1x8x128xf32>,
    %31 = vector.extract_strided_slice %6 {offsets = [3, 0, 0], sizes = [1, 8, 16], strides = [1, 1, 1]} : vector<8x8x16xbf16> to vector<1x8x16xbf16>
    %32 = vector.shape_cast %31 : vector<1x8x16xbf16> to vector<8x16xbf16>
    %cst_16 = arith.constant dense<0.000000e+00> : vector<8x128xf32>
    %33 = tpu.matmul %32, %3, %cst_16 {dimension_numbers = #tpu.dot_dimension_numbers<[1], [0], [0], [1], [0, 0, 1, 1], [], []>} : vector<8x16xbf16>, vector<16x128xbf16>, vector<8x128xf32> -> vector<8x128xf32>
    %34 = vector.broadcast %4 : vector<1x128xf32> to vector<8x128xf32>
    %35 = arith.addf %33, %34 : vector<8x128xf32>
    %c3 = arith.constant 3 : index
    %c0_17 = arith.constant 0 : index
    %c0_18 = arith.constant 0 : index
    %36 = vector.load %arg11[%c3, %c0_17, %c0_18] : memref<8x8x128xf32, #tpu.memory_space<vmem>>, vector<1x8x128xf32>
    %37 = vector.shape_cast %36 : vector<1x8x128xf32> to vector<8x128xf32>
    %38 = vector.shape_cast %35 : vector<8x128xf32> to vector<1x8x128xf32>
    tpu.vector_store %arg11[%c3, %c0_17, %c0_18], %38 {strides = array<i32>} : memref<8x8x128xf32, #tpu.memory_space<vmem>>, vector<1x8x128xf32>,
    %39 = vector.extract_strided_slice %6 {offsets = [4, 0, 0], sizes = [1, 8, 16], strides = [1, 1, 1]} : vector<8x8x16xbf16> to vector<1x8x16xbf16>
    %40 = vector.shape_cast %39 : vector<1x8x16xbf16> to vector<8x16xbf16>
    %cst_19 = arith.constant dense<0.000000e+00> : vector<8x128xf32>
    %41 = tpu.matmul %40, %3, %cst_19 {dimension_numbers = #tpu.dot_dimension_numbers<[1], [0], [0], [1], [0, 0, 1, 1], [], []>} : vector<8x16xbf16>, vector<16x128xbf16>, vector<8x128xf32> -> vector<8x128xf32>
    %42 = vector.broadcast %4 : vector<1x128xf32> to vector<8x128xf32>
    %43 = arith.addf %41, %42 : vector<8x128xf32>
    %c4 = arith.constant 4 : index
    %c0_20 = arith.constant 0 : index
    %c0_21 = arith.constant 0 : index
    %44 = vector.load %arg11[%c4, %c0_20, %c0_21] : memref<8x8x128xf32, #tpu.memory_space<vmem>>, vector<1x8x128xf32>
    %45 = vector.shape_cast %44 : vector<1x8x128xf32> to vector<8x128xf32>
    %46 = vector.shape_cast %43 : vector<8x128xf32> to vector<1x8x128xf32>
    tpu.vector_store %arg11[%c4, %c0_20, %c0_21], %46 {strides = array<i32>} : memref<8x8x128xf32, #tpu.memory_space<vmem>>, vector<1x8x128xf32>,
    %47 = vector.extract_strided_slice %6 {offsets = [5, 0, 0], sizes = [1, 8, 16], strides = [1, 1, 1]} : vector<8x8x16xbf16> to vector<1x8x16xbf16>
    %48 = vector.shape_cast %47 : vector<1x8x16xbf16> to vector<8x16xbf16>
    %cst_22 = arith.constant dense<0.000000e+00> : vector<8x128xf32>
    %49 = tpu.matmul %48, %3, %cst_22 {dimension_numbers = #tpu.dot_dimension_numbers<[1], [0], [0], [1], [0, 0, 1, 1], [], []>} : vector<8x16xbf16>, vector<16x128xbf16>, vector<8x128xf32> -> vector<8x128xf32>
    %50 = vector.broadcast %4 : vector<1x128xf32> to vector<8x128xf32>
    %51 = arith.addf %49, %50 : vector<8x128xf32>
    %c5 = arith.constant 5 : index
    %c0_23 = arith.constant 0 : index
    %c0_24 = arith.constant 0 : index
    %52 = vector.load %arg11[%c5, %c0_23, %c0_24] : memref<8x8x128xf32, #tpu.memory_space<vmem>>, vector<1x8x128xf32>
    %53 = vector.shape_cast %52 : vector<1x8x128xf32> to vector<8x128xf32>
    %54 = vector.shape_cast %51 : vector<8x128xf32> to vector<1x8x128xf32>
    tpu.vector_store %arg11[%c5, %c0_23, %c0_24], %54 {strides = array<i32>} : memref<8x8x128xf32, #tpu.memory_space<vmem>>, vector<1x8x128xf32>,
    %55 = vector.extract_strided_slice %6 {offsets = [6, 0, 0], sizes = [1, 8, 16], strides = [1, 1, 1]} : vector<8x8x16xbf16> to vector<1x8x16xbf16>
    %56 = vector.shape_cast %55 : vector<1x8x16xbf16> to vector<8x16xbf16>
    %cst_25 = arith.constant dense<0.000000e+00> : vector<8x128xf32>
    %57 = tpu.matmul %56, %3, %cst_25 {dimension_numbers = #tpu.dot_dimension_numbers<[1], [0], [0], [1], [0, 0, 1, 1], [], []>} : vector<8x16xbf16>, vector<16x128xbf16>, vector<8x128xf32> -> vector<8x128xf32>
    %58 = vector.broadcast %4 : vector<1x128xf32> to vector<8x128xf32>
    %59 = arith.addf %57, %58 : vector<8x128xf32>
    %c6 = arith.constant 6 : index
    %c0_26 = arith.constant 0 : index
    %c0_27 = arith.constant 0 : index
    %60 = vector.load %arg11[%c6, %c0_26, %c0_27] : memref<8x8x128xf32, #tpu.memory_space<vmem>>, vector<1x8x128xf32>
    %61 = vector.shape_cast %60 : vector<1x8x128xf32> to vector<8x128xf32>
    %62 = vector.shape_cast %59 : vector<8x128xf32> to vector<1x8x128xf32>
    tpu.vector_store %arg11[%c6, %c0_26, %c0_27], %62 {strides = array<i32>} : memref<8x8x128xf32, #tpu.memory_space<vmem>>, vector<1x8x128xf32>,
    %63 = vector.extract_strided_slice %6 {offsets = [7, 0, 0], sizes = [1, 8, 16], strides = [1, 1, 1]} : vector<8x8x16xbf16> to vector<1x8x16xbf16>
    %64 = vector.shape_cast %63 : vector<1x8x16xbf16> to vector<8x16xbf16>
    %cst_28 = arith.constant dense<0.000000e+00> : vector<8x128xf32>
    %65 = tpu.matmul %64, %3, %cst_28 {dimension_numbers = #tpu.dot_dimension_numbers<[1], [0], [0], [1], [0, 0, 1, 1], [], []>} : vector<8x16xbf16>, vector<16x128xbf16>, vector<8x128xf32> -> vector<8x128xf32>
    %66 = vector.broadcast %4 : vector<1x128xf32> to vector<8x128xf32>
    %67 = arith.addf %65, %66 : vector<8x128xf32>
    %c7 = arith.constant 7 : index
    %c0_29 = arith.constant 0 : index
    %c0_30 = arith.constant 0 : index
    %68 = vector.load %arg11[%c7, %c0_29, %c0_30] : memref<8x8x128xf32, #tpu.memory_space<vmem>>, vector<1x8x128xf32>
    %69 = vector.shape_cast %68 : vector<1x8x128xf32> to vector<8x128xf32>
    %70 = vector.shape_cast %67 : vector<8x128xf32> to vector<1x8x128xf32>
    tpu.vector_store %arg11[%c7, %c0_29, %c0_30], %70 {strides = array<i32>} : memref<8x8x128xf32, #tpu.memory_space<vmem>>, vector<1x8x128xf32>,
    %c0_31 = arith.constant 0 : index
    %c0_32 = arith.constant 0 : index
    %71 = vector.load %arg5[%c0_31, %c0_32] : memref<32x128xbf16, #tpu.memory_space<vmem>>, vector<32x128xbf16>
    %c0_33 = arith.constant 0 : index
    %c0_34 = arith.constant 0 : index
    %72 = vector.load %arg12[%c0_33, %c0_34] : memref<8x32xf32, #tpu.memory_space<vmem>>, vector<8x32xf32>
    %c0_35 = arith.constant 0 : index
    %c0_36 = arith.constant 0 : index
    %73 = vector.load %arg13[%c0_35, %c0_36] : memref<8x32xf32, #tpu.memory_space<vmem>>, vector<8x32xf32>
    %c0_i32_37 = arith.constant 0 : i32
    %74 = arith.index_cast %c0_i32_37 : i32 to index
    %c0_38 = arith.constant 0 : index
    %c0_39 = arith.constant 0 : index
    %75 = vector.load %arg11[%74, %c0_38, %c0_39] : memref<8x8x128xf32, #tpu.memory_space<vmem>>, vector<1x8x128xf32>
    %76 = vector.shape_cast %75 : vector<1x8x128xf32> to vector<8x128xf32>
    %77 = arith.truncf %72 : vector<8x32xf32> to vector<8x32xbf16>
    %cst_40 = arith.constant dense<0.000000e+00> : vector<8x128xf32>
    %78 = tpu.matmul %77, %71, %cst_40 {dimension_numbers = #tpu.dot_dimension_numbers<[1], [0], [0], [1], [0, 0, 1, 1], [], []>} : vector<8x32xbf16>, vector<32x128xbf16>, vector<8x128xf32> -> vector<8x128xf32>
    %79 = arith.addf %76, %78 : vector<8x128xf32>
    %80 = math.tanh %79 : vector<8x128xf32>
    %81 = vector.extract_strided_slice %80 {offsets = [0, 0], sizes = [8, 32], strides = [1, 1]} : vector<8x128xf32> to vector<8x32xf32>
    %cst_41 = arith.constant 5.000000e-01 : f32
    %82 = vector.broadcast %cst_41 : f32 to vector<8x32xf32>
    %83 = arith.mulf %82, %81 : vector<8x32xf32>
    %cst_42 = arith.constant 5.000000e-01 : f32
    %84 = vector.broadcast %cst_42 : f32 to vector<8x32xf32>
    %85 = arith.addf %83, %84 : vector<8x32xf32>
    %86 = vector.extract_strided_slice %80 {offsets = [0, 32], sizes = [8, 32], strides = [1, 1]} : vector<8x128xf32> to vector<8x32xf32>
    %cst_43 = arith.constant 5.000000e-01 : f32
    %87 = vector.broadcast %cst_43 : f32 to vector<8x32xf32>
    %88 = arith.mulf %87, %86 : vector<8x32xf32>
    %cst_44 = arith.constant 5.000000e-01 : f32
    %89 = vector.broadcast %cst_44 : f32 to vector<8x32xf32>
    %90 = arith.addf %88, %89 : vector<8x32xf32>
    %91 = vector.extract_strided_slice %80 {offsets = [0, 64], sizes = [8, 32], strides = [1, 1]} : vector<8x128xf32> to vector<8x32xf32>
    %92 = vector.extract_strided_slice %80 {offsets = [0, 96], sizes = [8, 32], strides = [1, 1]} : vector<8x128xf32> to vector<8x32xf32>
    %cst_45 = arith.constant 5.000000e-01 : f32
    %93 = vector.broadcast %cst_45 : f32 to vector<8x32xf32>
    %94 = arith.mulf %93, %92 : vector<8x32xf32>
    %cst_46 = arith.constant 5.000000e-01 : f32
    %95 = vector.broadcast %cst_46 : f32 to vector<8x32xf32>
    %96 = arith.addf %94, %95 : vector<8x32xf32>
    %97 = arith.mulf %90, %73 : vector<8x32xf32>
    %98 = arith.mulf %85, %91 : vector<8x32xf32>
    %99 = arith.addf %97, %98 : vector<8x32xf32>
    %100 = math.tanh %99 : vector<8x32xf32>
    %101 = arith.mulf %96, %100 : vector<8x32xf32>
    %c1_i32 = arith.constant 1 : i32
    %102 = arith.index_cast %c1_i32 : i32 to index
    %c0_47 = arith.constant 0 : index
    %c0_48 = arith.constant 0 : index
    %103 = vector.load %arg11[%102, %c0_47, %c0_48] : memref<8x8x128xf32, #tpu.memory_space<vmem>>, vector<1x8x128xf32>
    %104 = vector.shape_cast %103 : vector<1x8x128xf32> to vector<8x128xf32>
    %105 = arith.truncf %101 : vector<8x32xf32> to vector<8x32xbf16>
    %cst_49 = arith.constant dense<0.000000e+00> : vector<8x128xf32>
    %106 = tpu.matmul %105, %71, %cst_49 {dimension_numbers = #tpu.dot_dimension_numbers<[1], [0], [0], [1], [0, 0, 1, 1], [], []>} : vector<8x32xbf16>, vector<32x128xbf16>, vector<8x128xf32> -> vector<8x128xf32>
    %107 = arith.addf %104, %106 : vector<8x128xf32>
    %108 = math.tanh %107 : vector<8x128xf32>
    %109 = vector.extract_strided_slice %108 {offsets = [0, 0], sizes = [8, 32], strides = [1, 1]} : vector<8x128xf32> to vector<8x32xf32>
    %cst_50 = arith.constant 5.000000e-01 : f32
    %110 = vector.broadcast %cst_50 : f32 to vector<8x32xf32>
    %111 = arith.mulf %110, %109 : vector<8x32xf32>
    %cst_51 = arith.constant 5.000000e-01 : f32
    %112 = vector.broadcast %cst_51 : f32 to vector<8x32xf32>
    %113 = arith.addf %111, %112 : vector<8x32xf32>
    %114 = vector.extract_strided_slice %108 {offsets = [0, 32], sizes = [8, 32], strides = [1, 1]} : vector<8x128xf32> to vector<8x32xf32>
    %cst_52 = arith.constant 5.000000e-01 : f32
    %115 = vector.broadcast %cst_52 : f32 to vector<8x32xf32>
    %116 = arith.mulf %115, %114 : vector<8x32xf32>
    %cst_53 = arith.constant 5.000000e-01 : f32
    %117 = vector.broadcast %cst_53 : f32 to vector<8x32xf32>
    %118 = arith.addf %116, %117 : vector<8x32xf32>
    %119 = vector.extract_strided_slice %108 {offsets = [0, 64], sizes = [8, 32], strides = [1, 1]} : vector<8x128xf32> to vector<8x32xf32>
    %120 = vector.extract_strided_slice %108 {offsets = [0, 96], sizes = [8, 32], strides = [1, 1]} : vector<8x128xf32> to vector<8x32xf32>
    %cst_54 = arith.constant 5.000000e-01 : f32
    %121 = vector.broadcast %cst_54 : f32 to vector<8x32xf32>
    %122 = arith.mulf %121, %120 : vector<8x32xf32>
    %cst_55 = arith.constant 5.000000e-01 : f32
    %123 = vector.broadcast %cst_55 : f32 to vector<8x32xf32>
    %124 = arith.addf %122, %123 : vector<8x32xf32>
    %125 = arith.mulf %118, %99 : vector<8x32xf32>
    %126 = arith.mulf %113, %119 : vector<8x32xf32>
    %127 = arith.addf %125, %126 : vector<8x32xf32>
    %128 = math.tanh %127 : vector<8x32xf32>
    %129 = arith.mulf %124, %128 : vector<8x32xf32>
    %c2_i32 = arith.constant 2 : i32
    %130 = arith.index_cast %c2_i32 : i32 to index
    %c0_56 = arith.constant 0 : index
    %c0_57 = arith.constant 0 : index
    %131 = vector.load %arg11[%130, %c0_56, %c0_57] : memref<8x8x128xf32, #tpu.memory_space<vmem>>, vector<1x8x128xf32>
    %132 = vector.shape_cast %131 : vector<1x8x128xf32> to vector<8x128xf32>
    %133 = arith.truncf %129 : vector<8x32xf32> to vector<8x32xbf16>
    %cst_58 = arith.constant dense<0.000000e+00> : vector<8x128xf32>
    %134 = tpu.matmul %133, %71, %cst_58 {dimension_numbers = #tpu.dot_dimension_numbers<[1], [0], [0], [1], [0, 0, 1, 1], [], []>} : vector<8x32xbf16>, vector<32x128xbf16>, vector<8x128xf32> -> vector<8x128xf32>
    %135 = arith.addf %132, %134 : vector<8x128xf32>
    %136 = math.tanh %135 : vector<8x128xf32>
    %137 = vector.extract_strided_slice %136 {offsets = [0, 0], sizes = [8, 32], strides = [1, 1]} : vector<8x128xf32> to vector<8x32xf32>
    %cst_59 = arith.constant 5.000000e-01 : f32
    %138 = vector.broadcast %cst_59 : f32 to vector<8x32xf32>
    %139 = arith.mulf %138, %137 : vector<8x32xf32>
    %cst_60 = arith.constant 5.000000e-01 : f32
    %140 = vector.broadcast %cst_60 : f32 to vector<8x32xf32>
    %141 = arith.addf %139, %140 : vector<8x32xf32>
    %142 = vector.extract_strided_slice %136 {offsets = [0, 32], sizes = [8, 32], strides = [1, 1]} : vector<8x128xf32> to vector<8x32xf32>
    %cst_61 = arith.constant 5.000000e-01 : f32
    %143 = vector.broadcast %cst_61 : f32 to vector<8x32xf32>
    %144 = arith.mulf %143, %142 : vector<8x32xf32>
    %cst_62 = arith.constant 5.000000e-01 : f32
    %145 = vector.broadcast %cst_62 : f32 to vector<8x32xf32>
    %146 = arith.addf %144, %145 : vector<8x32xf32>
    %147 = vector.extract_strided_slice %136 {offsets = [0, 64], sizes = [8, 32], strides = [1, 1]} : vector<8x128xf32> to vector<8x32xf32>
    %148 = vector.extract_strided_slice %136 {offsets = [0, 96], sizes = [8, 32], strides = [1, 1]} : vector<8x128xf32> to vector<8x32xf32>
    %cst_63 = arith.constant 5.000000e-01 : f32
    %149 = vector.broadcast %cst_63 : f32 to vector<8x32xf32>
    %150 = arith.mulf %149, %148 : vector<8x32xf32>
    %cst_64 = arith.constant 5.000000e-01 : f32
    %151 = vector.broadcast %cst_64 : f32 to vector<8x32xf32>
    %152 = arith.addf %150, %151 : vector<8x32xf32>
    %153 = arith.mulf %146, %127 : vector<8x32xf32>
    %154 = arith.mulf %141, %147 : vector<8x32xf32>
    %155 = arith.addf %153, %154 : vector<8x32xf32>
    %156 = math.tanh %155 : vector<8x32xf32>
    %157 = arith.mulf %152, %156 : vector<8x32xf32>
    %c3_i32 = arith.constant 3 : i32
    %158 = arith.index_cast %c3_i32 : i32 to index
    %c0_65 = arith.constant 0 : index
    %c0_66 = arith.constant 0 : index
    %159 = vector.load %arg11[%158, %c0_65, %c0_66] : memref<8x8x128xf32, #tpu.memory_space<vmem>>, vector<1x8x128xf32>
    %160 = vector.shape_cast %159 : vector<1x8x128xf32> to vector<8x128xf32>
    %161 = arith.truncf %157 : vector<8x32xf32> to vector<8x32xbf16>
    %cst_67 = arith.constant dense<0.000000e+00> : vector<8x128xf32>
    %162 = tpu.matmul %161, %71, %cst_67 {dimension_numbers = #tpu.dot_dimension_numbers<[1], [0], [0], [1], [0, 0, 1, 1], [], []>} : vector<8x32xbf16>, vector<32x128xbf16>, vector<8x128xf32> -> vector<8x128xf32>
    %163 = arith.addf %160, %162 : vector<8x128xf32>
    %164 = math.tanh %163 : vector<8x128xf32>
    %165 = vector.extract_strided_slice %164 {offsets = [0, 0], sizes = [8, 32], strides = [1, 1]} : vector<8x128xf32> to vector<8x32xf32>
    %cst_68 = arith.constant 5.000000e-01 : f32
    %166 = vector.broadcast %cst_68 : f32 to vector<8x32xf32>
    %167 = arith.mulf %166, %165 : vector<8x32xf32>
    %cst_69 = arith.constant 5.000000e-01 : f32
    %168 = vector.broadcast %cst_69 : f32 to vector<8x32xf32>
    %169 = arith.addf %167, %168 : vector<8x32xf32>
    %170 = vector.extract_strided_slice %164 {offsets = [0, 32], sizes = [8, 32], strides = [1, 1]} : vector<8x128xf32> to vector<8x32xf32>
    %cst_70 = arith.constant 5.000000e-01 : f32
    %171 = vector.broadcast %cst_70 : f32 to vector<8x32xf32>
    %172 = arith.mulf %171, %170 : vector<8x32xf32>
    %cst_71 = arith.constant 5.000000e-01 : f32
    %173 = vector.broadcast %cst_71 : f32 to vector<8x32xf32>
    %174 = arith.addf %172, %173 : vector<8x32xf32>
    %175 = vector.extract_strided_slice %164 {offsets = [0, 64], sizes = [8, 32], strides = [1, 1]} : vector<8x128xf32> to vector<8x32xf32>
    %176 = vector.extract_strided_slice %164 {offsets = [0, 96], sizes = [8, 32], strides = [1, 1]} : vector<8x128xf32> to vector<8x32xf32>
    %cst_72 = arith.constant 5.000000e-01 : f32
    %177 = vector.broadcast %cst_72 : f32 to vector<8x32xf32>
    %178 = arith.mulf %177, %176 : vector<8x32xf32>
    %cst_73 = arith.constant 5.000000e-01 : f32
    %179 = vector.broadcast %cst_73 : f32 to vector<8x32xf32>
    %180 = arith.addf %178, %179 : vector<8x32xf32>
    %181 = arith.mulf %174, %155 : vector<8x32xf32>
    %182 = arith.mulf %169, %175 : vector<8x32xf32>
    %183 = arith.addf %181, %182 : vector<8x32xf32>
    %184 = math.tanh %183 : vector<8x32xf32>
    %185 = arith.mulf %180, %184 : vector<8x32xf32>
    %c4_i32 = arith.constant 4 : i32
    %186 = arith.index_cast %c4_i32 : i32 to index
    %c0_74 = arith.constant 0 : index
    %c0_75 = arith.constant 0 : index
    %187 = vector.load %arg11[%186, %c0_74, %c0_75] : memref<8x8x128xf32, #tpu.memory_space<vmem>>, vector<1x8x128xf32>
    %188 = vector.shape_cast %187 : vector<1x8x128xf32> to vector<8x128xf32>
    %189 = arith.truncf %185 : vector<8x32xf32> to vector<8x32xbf16>
    %cst_76 = arith.constant dense<0.000000e+00> : vector<8x128xf32>
    %190 = tpu.matmul %189, %71, %cst_76 {dimension_numbers = #tpu.dot_dimension_numbers<[1], [0], [0], [1], [0, 0, 1, 1], [], []>} : vector<8x32xbf16>, vector<32x128xbf16>, vector<8x128xf32> -> vector<8x128xf32>
    %191 = arith.addf %188, %190 : vector<8x128xf32>
    %192 = math.tanh %191 : vector<8x128xf32>
    %193 = vector.extract_strided_slice %192 {offsets = [0, 0], sizes = [8, 32], strides = [1, 1]} : vector<8x128xf32> to vector<8x32xf32>
    %cst_77 = arith.constant 5.000000e-01 : f32
    %194 = vector.broadcast %cst_77 : f32 to vector<8x32xf32>
    %195 = arith.mulf %194, %193 : vector<8x32xf32>
    %cst_78 = arith.constant 5.000000e-01 : f32
    %196 = vector.broadcast %cst_78 : f32 to vector<8x32xf32>
    %197 = arith.addf %195, %196 : vector<8x32xf32>
    %198 = vector.extract_strided_slice %192 {offsets = [0, 32], sizes = [8, 32], strides = [1, 1]} : vector<8x128xf32> to vector<8x32xf32>
    %cst_79 = arith.constant 5.000000e-01 : f32
    %199 = vector.broadcast %cst_79 : f32 to vector<8x32xf32>
    %200 = arith.mulf %199, %198 : vector<8x32xf32>
    %cst_80 = arith.constant 5.000000e-01 : f32
    %201 = vector.broadcast %cst_80 : f32 to vector<8x32xf32>
    %202 = arith.addf %200, %201 : vector<8x32xf32>
    %203 = vector.extract_strided_slice %192 {offsets = [0, 64], sizes = [8, 32], strides = [1, 1]} : vector<8x128xf32> to vector<8x32xf32>
    %204 = vector.extract_strided_slice %192 {offsets = [0, 96], sizes = [8, 32], strides = [1, 1]} : vector<8x128xf32> to vector<8x32xf32>
    %cst_81 = arith.constant 5.000000e-01 : f32
    %205 = vector.broadcast %cst_81 : f32 to vector<8x32xf32>
    %206 = arith.mulf %205, %204 : vector<8x32xf32>
    %cst_82 = arith.constant 5.000000e-01 : f32
    %207 = vector.broadcast %cst_82 : f32 to vector<8x32xf32>
    %208 = arith.addf %206, %207 : vector<8x32xf32>
    %209 = arith.mulf %202, %183 : vector<8x32xf32>
    %210 = arith.mulf %197, %203 : vector<8x32xf32>
    %211 = arith.addf %209, %210 : vector<8x32xf32>
    %212 = math.tanh %211 : vector<8x32xf32>
    %213 = arith.mulf %208, %212 : vector<8x32xf32>
    %c5_i32 = arith.constant 5 : i32
    %214 = arith.index_cast %c5_i32 : i32 to index
    %c0_83 = arith.constant 0 : index
    %c0_84 = arith.constant 0 : index
    %215 = vector.load %arg11[%214, %c0_83, %c0_84] : memref<8x8x128xf32, #tpu.memory_space<vmem>>, vector<1x8x128xf32>
    %216 = vector.shape_cast %215 : vector<1x8x128xf32> to vector<8x128xf32>
    %217 = arith.truncf %213 : vector<8x32xf32> to vector<8x32xbf16>
    %cst_85 = arith.constant dense<0.000000e+00> : vector<8x128xf32>
    %218 = tpu.matmul %217, %71, %cst_85 {dimension_numbers = #tpu.dot_dimension_numbers<[1], [0], [0], [1], [0, 0, 1, 1], [], []>} : vector<8x32xbf16>, vector<32x128xbf16>, vector<8x128xf32> -> vector<8x128xf32>
    %219 = arith.addf %216, %218 : vector<8x128xf32>
    %220 = math.tanh %219 : vector<8x128xf32>
    %221 = vector.extract_strided_slice %220 {offsets = [0, 0], sizes = [8, 32], strides = [1, 1]} : vector<8x128xf32> to vector<8x32xf32>
    %cst_86 = arith.constant 5.000000e-01 : f32
    %222 = vector.broadcast %cst_86 : f32 to vector<8x32xf32>
    %223 = arith.mulf %222, %221 : vector<8x32xf32>
    %cst_87 = arith.constant 5.000000e-01 : f32
    %224 = vector.broadcast %cst_87 : f32 to vector<8x32xf32>
    %225 = arith.addf %223, %224 : vector<8x32xf32>
    %226 = vector.extract_strided_slice %220 {offsets = [0, 32], sizes = [8, 32], strides = [1, 1]} : vector<8x128xf32> to vector<8x32xf32>
    %cst_88 = arith.constant 5.000000e-01 : f32
    %227 = vector.broadcast %cst_88 : f32 to vector<8x32xf32>
    %228 = arith.mulf %227, %226 : vector<8x32xf32>
    %cst_89 = arith.constant 5.000000e-01 : f32
    %229 = vector.broadcast %cst_89 : f32 to vector<8x32xf32>
    %230 = arith.addf %228, %229 : vector<8x32xf32>
    %231 = vector.extract_strided_slice %220 {offsets = [0, 64], sizes = [8, 32], strides = [1, 1]} : vector<8x128xf32> to vector<8x32xf32>
    %232 = vector.extract_strided_slice %220 {offsets = [0, 96], sizes = [8, 32], strides = [1, 1]} : vector<8x128xf32> to vector<8x32xf32>
    %cst_90 = arith.constant 5.000000e-01 : f32
    %233 = vector.broadcast %cst_90 : f32 to vector<8x32xf32>
    %234 = arith.mulf %233, %232 : vector<8x32xf32>
    %cst_91 = arith.constant 5.000000e-01 : f32
    %235 = vector.broadcast %cst_91 : f32 to vector<8x32xf32>
    %236 = arith.addf %234, %235 : vector<8x32xf32>
    %237 = arith.mulf %230, %211 : vector<8x32xf32>
    %238 = arith.mulf %225, %231 : vector<8x32xf32>
    %239 = arith.addf %237, %238 : vector<8x32xf32>
    %240 = math.tanh %239 : vector<8x32xf32>
    %241 = arith.mulf %236, %240 : vector<8x32xf32>
    %c6_i32 = arith.constant 6 : i32
    %242 = arith.index_cast %c6_i32 : i32 to index
    %c0_92 = arith.constant 0 : index
    %c0_93 = arith.constant 0 : index
    %243 = vector.load %arg11[%242, %c0_92, %c0_93] : memref<8x8x128xf32, #tpu.memory_space<vmem>>, vector<1x8x128xf32>
    %244 = vector.shape_cast %243 : vector<1x8x128xf32> to vector<8x128xf32>
    %245 = arith.truncf %241 : vector<8x32xf32> to vector<8x32xbf16>
    %cst_94 = arith.constant dense<0.000000e+00> : vector<8x128xf32>
    %246 = tpu.matmul %245, %71, %cst_94 {dimension_numbers = #tpu.dot_dimension_numbers<[1], [0], [0], [1], [0, 0, 1, 1], [], []>} : vector<8x32xbf16>, vector<32x128xbf16>, vector<8x128xf32> -> vector<8x128xf32>
    %247 = arith.addf %244, %246 : vector<8x128xf32>
    %248 = math.tanh %247 : vector<8x128xf32>
    %249 = vector.extract_strided_slice %248 {offsets = [0, 0], sizes = [8, 32], strides = [1, 1]} : vector<8x128xf32> to vector<8x32xf32>
    %cst_95 = arith.constant 5.000000e-01 : f32
    %250 = vector.broadcast %cst_95 : f32 to vector<8x32xf32>
    %251 = arith.mulf %250, %249 : vector<8x32xf32>
    %cst_96 = arith.constant 5.000000e-01 : f32
    %252 = vector.broadcast %cst_96 : f32 to vector<8x32xf32>
    %253 = arith.addf %251, %252 : vector<8x32xf32>
    %254 = vector.extract_strided_slice %248 {offsets = [0, 32], sizes = [8, 32], strides = [1, 1]} : vector<8x128xf32> to vector<8x32xf32>
    %cst_97 = arith.constant 5.000000e-01 : f32
    %255 = vector.broadcast %cst_97 : f32 to vector<8x32xf32>
    %256 = arith.mulf %255, %254 : vector<8x32xf32>
    %cst_98 = arith.constant 5.000000e-01 : f32
    %257 = vector.broadcast %cst_98 : f32 to vector<8x32xf32>
    %258 = arith.addf %256, %257 : vector<8x32xf32>
    %259 = vector.extract_strided_slice %248 {offsets = [0, 64], sizes = [8, 32], strides = [1, 1]} : vector<8x128xf32> to vector<8x32xf32>
    %260 = vector.extract_strided_slice %248 {offsets = [0, 96], sizes = [8, 32], strides = [1, 1]} : vector<8x128xf32> to vector<8x32xf32>
    %cst_99 = arith.constant 5.000000e-01 : f32
    %261 = vector.broadcast %cst_99 : f32 to vector<8x32xf32>
    %262 = arith.mulf %261, %260 : vector<8x32xf32>
    %cst_100 = arith.constant 5.000000e-01 : f32
    %263 = vector.broadcast %cst_100 : f32 to vector<8x32xf32>
    %264 = arith.addf %262, %263 : vector<8x32xf32>
    %265 = arith.mulf %258, %239 : vector<8x32xf32>
    %266 = arith.mulf %253, %259 : vector<8x32xf32>
    %267 = arith.addf %265, %266 : vector<8x32xf32>
    %268 = math.tanh %267 : vector<8x32xf32>
    %269 = arith.mulf %264, %268 : vector<8x32xf32>
    %c7_i32 = arith.constant 7 : i32
    %270 = arith.index_cast %c7_i32 : i32 to index
    %c0_101 = arith.constant 0 : index
    %c0_102 = arith.constant 0 : index
    %271 = vector.load %arg11[%270, %c0_101, %c0_102] : memref<8x8x128xf32, #tpu.memory_space<vmem>>, vector<1x8x128xf32>
    %272 = vector.shape_cast %271 : vector<1x8x128xf32> to vector<8x128xf32>
    %273 = arith.truncf %269 : vector<8x32xf32> to vector<8x32xbf16>
    %cst_103 = arith.constant dense<0.000000e+00> : vector<8x128xf32>
    %274 = tpu.matmul %273, %71, %cst_103 {dimension_numbers = #tpu.dot_dimension_numbers<[1], [0], [0], [1], [0, 0, 1, 1], [], []>} : vector<8x32xbf16>, vector<32x128xbf16>, vector<8x128xf32> -> vector<8x128xf32>
    %275 = arith.addf %272, %274 : vector<8x128xf32>
    %276 = math.tanh %275 : vector<8x128xf32>
    %277 = vector.extract_strided_slice %276 {offsets = [0, 0], sizes = [8, 32], strides = [1, 1]} : vector<8x128xf32> to vector<8x32xf32>
    %cst_104 = arith.constant 5.000000e-01 : f32
    %278 = vector.broadcast %cst_104 : f32 to vector<8x32xf32>
    %279 = arith.mulf %278, %277 : vector<8x32xf32>
    %cst_105 = arith.constant 5.000000e-01 : f32
    %280 = vector.broadcast %cst_105 : f32 to vector<8x32xf32>
    %281 = arith.addf %279, %280 : vector<8x32xf32>
    %282 = vector.extract_strided_slice %276 {offsets = [0, 32], sizes = [8, 32], strides = [1, 1]} : vector<8x128xf32> to vector<8x32xf32>
    %cst_106 = arith.constant 5.000000e-01 : f32
    %283 = vector.broadcast %cst_106 : f32 to vector<8x32xf32>
    %284 = arith.mulf %283, %282 : vector<8x32xf32>
    %cst_107 = arith.constant 5.000000e-01 : f32
    %285 = vector.broadcast %cst_107 : f32 to vector<8x32xf32>
    %286 = arith.addf %284, %285 : vector<8x32xf32>
    %287 = vector.extract_strided_slice %276 {offsets = [0, 64], sizes = [8, 32], strides = [1, 1]} : vector<8x128xf32> to vector<8x32xf32>
    %288 = vector.extract_strided_slice %276 {offsets = [0, 96], sizes = [8, 32], strides = [1, 1]} : vector<8x128xf32> to vector<8x32xf32>
    %cst_108 = arith.constant 5.000000e-01 : f32
    %289 = vector.broadcast %cst_108 : f32 to vector<8x32xf32>
    %290 = arith.mulf %289, %288 : vector<8x32xf32>
    %cst_109 = arith.constant 5.000000e-01 : f32
    %291 = vector.broadcast %cst_109 : f32 to vector<8x32xf32>
    %292 = arith.addf %290, %291 : vector<8x32xf32>
    %293 = arith.mulf %286, %267 : vector<8x32xf32>
    %294 = arith.mulf %281, %287 : vector<8x32xf32>
    %295 = arith.addf %293, %294 : vector<8x32xf32>
    %296 = math.tanh %295 : vector<8x32xf32>
    %297 = arith.mulf %292, %296 : vector<8x32xf32>
    %c8_i32 = arith.constant 8 : i32
    %c0_110 = arith.constant 0 : index
    %c0_111 = arith.constant 0 : index
    %298 = vector.load %arg12[%c0_110, %c0_111] : memref<8x32xf32, #tpu.memory_space<vmem>>, vector<8x32xf32>
    tpu.vector_store %arg12[%c0_110, %c0_111], %297 {strides = array<i32>} : memref<8x32xf32, #tpu.memory_space<vmem>>, vector<8x32xf32>,
    %c0_112 = arith.constant 0 : index
    %c0_113 = arith.constant 0 : index
    %299 = vector.load %arg13[%c0_112, %c0_113] : memref<8x32xf32, #tpu.memory_space<vmem>>, vector<8x32xf32>
    tpu.vector_store %arg13[%c0_112, %c0_113], %295 {strides = array<i32>} : memref<8x32xf32, #tpu.memory_space<vmem>>, vector<8x32xf32>,
    %c0_i32_114 = arith.constant 0 : i32
    %300 = arith.cmpi eq, %arg1, %c0_i32_114 : i32
    %301 = arith.extui %300 : i1 to i32
    %c0_i32_115 = arith.constant 0 : i32
    %302 = arith.cmpi ne, %301, %c0_i32_115 : i32
    scf.if %302 {
      %c0_116 = arith.constant 0 : index
      %c0_117 = arith.constant 0 : index
      %303 = vector.load %arg6[%c0_116, %c0_117] : memref<32x32xf32, #tpu.memory_space<vmem>>, vector<32x32xf32>
      %cst_118 = arith.constant dense<0.000000e+00> : vector<8x32xf32>
      %304 = tpu.matmul %297, %303, %cst_118 {dimension_numbers = #tpu.dot_dimension_numbers<[1], [0], [0], [1], [0, 0, 1, 1], [], []>} : vector<8x32xf32>, vector<32x32xf32>, vector<8x32xf32> -> vector<8x32xf32>
      %c0_119 = arith.constant 0 : index
      %c0_120 = arith.constant 0 : index
      %305 = vector.load %arg7[%c0_119, %c0_120] : memref<1x32xf32, #tpu.memory_space<vmem>>, vector<1x32xf32>
      %306 = vector.broadcast %305 : vector<1x32xf32> to vector<8x32xf32>
      %307 = arith.addf %304, %306 : vector<8x32xf32>
      %cst_121 = arith.constant 0.000000e+00 : f32
      %308 = vector.broadcast %cst_121 : f32 to vector<8x32xf32>
      %309 = arith.maximumf %307, %308 : vector<8x32xf32>
      %c0_122 = arith.constant 0 : index
      %c0_123 = arith.constant 0 : index
      %310 = vector.load %arg8[%c0_122, %c0_123] : memref<1x32xf32, #tpu.memory_space<vmem>>, vector<1x32xf32>
      %311 = vector.broadcast %310 : vector<1x32xf32> to vector<8x32xf32>
      %312 = arith.mulf %309, %311 : vector<8x32xf32>
      %cst_124 = arith.constant dense<0.000000e+00> : vector<8xf32>
      %313 = vector.multi_reduction <add>, %312, %cst_124 [1] : vector<8x32xf32> to vector<8xf32>
      %314 = vector.shape_cast %313 : vector<8xf32> to vector<8x1xf32>
      %c0_125 = arith.constant 0 : index
      %c0_126 = arith.constant 0 : index
      %315 = vector.load %arg9[%c0_125, %c0_126] : memref<1x1xf32, #tpu.memory_space<vmem>>, vector<1x1xf32>
      %316 = vector.broadcast %315 : vector<1x1xf32> to vector<8x1xf32>
      %317 = arith.addf %314, %316 : vector<8x1xf32>
      %c0_127 = arith.constant 0 : index
      %c0_128 = arith.constant 0 : index
      %318 = vector.load %arg10[%c0_127, %c0_128] : memref<8x1xf32, #tpu.memory_space<vmem>>, vector<8x1xf32>
      tpu.vector_store %arg10[%c0_127, %c0_128], %317 {strides = array<i32>} : memref<8x1xf32, #tpu.memory_space<vmem>>, vector<8x1xf32>,
    } else {
    }
    return
  }
  func.func @transform_0(%arg0: i32, %arg1: i32) -> (i32, i32, i32) {
    %c0_i32 = arith.constant 0 : i32
    %c0_i32_0 = arith.constant 0 : i32
    return %arg1, %arg0, %c0_i32 : i32, i32, i32
  }
  func.func @transform_1(%arg0: i32, %arg1: i32) -> (i32, i32) {
    %c0_i32 = arith.constant 0 : i32
    %c0_i32_0 = arith.constant 0 : i32
    %c0_i32_1 = arith.constant 0 : i32
    return %c0_i32, %c0_i32_0 : i32, i32
  }
  func.func @transform_2(%arg0: i32, %arg1: i32) -> (i32, i32) {
    %c0_i32 = arith.constant 0 : i32
    %c0_i32_0 = arith.constant 0 : i32
    %c0_i32_1 = arith.constant 0 : i32
    return %c0_i32, %c0_i32_0 : i32, i32
  }
  func.func @transform_3(%arg0: i32, %arg1: i32) -> (i32, i32) {
    %c0_i32 = arith.constant 0 : i32
    %c0_i32_0 = arith.constant 0 : i32
    %c0_i32_1 = arith.constant 0 : i32
    return %c0_i32, %c0_i32_0 : i32, i32
  }
  func.func @transform_4(%arg0: i32, %arg1: i32) -> (i32, i32) {
    %c0_i32 = arith.constant 0 : i32
    %c0_i32_0 = arith.constant 0 : i32
    %c0_i32_1 = arith.constant 0 : i32
    return %c0_i32, %c0_i32_0 : i32, i32
  }
  func.func @transform_5(%arg0: i32, %arg1: i32) -> (i32, i32) {
    %c0_i32 = arith.constant 0 : i32
    %c0_i32_0 = arith.constant 0 : i32
    %c0_i32_1 = arith.constant 0 : i32
    return %c0_i32, %c0_i32_0 : i32, i32
  }
  func.func @transform_6(%arg0: i32, %arg1: i32) -> (i32, i32) {
    %c0_i32 = arith.constant 0 : i32
    %c0_i32_0 = arith.constant 0 : i32
    %c0_i32_1 = arith.constant 0 : i32
    return %c0_i32, %c0_i32_0 : i32, i32
  }
  func.func @transform_7(%arg0: i32, %arg1: i32) -> (i32, i32) {
    %c0_i32 = arith.constant 0 : i32
    %c0_i32_0 = arith.constant 0 : i32
    %c0_i32_1 = arith.constant 0 : i32
    return %c0_i32, %c0_i32_0 : i32, i32
  }
  func.func @transform_8(%arg0: i32, %arg1: i32) -> (i32, i32) {
    %c0_i32 = arith.constant 0 : i32
    %c0_i32_0 = arith.constant 0 : i32
    return %arg0, %c0_i32 : i32, i32
  }
}

</mosaic_0001>

<bundles_post_ra>
// kernel: tpu_custom_call.1
= control target key start
LH: loop header
LB: loop body
LE: loop exit
PB: predicated region body
PF: predicated region fallthrough
CT: control target
= control target key end

     0   :  { %s1857_s0 = inlined_call_operand.hbm [shape: f32[8,8,16], index: 0, kind: input, shape index: {}]   ;;  %s1858_s1 = inlined_call_operand.hbm [shape: bf16[16,128], index: 1, kind: input, shape index: {}]   ;;  %s1859_s2 = inlined_call_operand.vmem [shape: f32[1,128], index: 2, kind: input, shape index: {}]   ;;  %s1860_s3 = inlined_call_operand.hbm [shape: bf16[32,128], index: 3, kind: input, shape index: {}]   ;;  %s1861_s4 = inlined_call_operand.hbm [shape: f32[32,32], index: 4, kind: input, shape index: {}]   ;;  %s1862_s5 = inlined_call_operand.vmem [shape: f32[1,32], index: 5, kind: input, shape index: {}]   ;;  %s1863_s6 = inlined_call_operand.vmem [shape: f32[1,32], index: 6, kind: input, shape index: {}]   ;;  %s1864_s7 = inlined_call_operand.<no memory space> [shape: f32[1,1], index: 7, kind: input, shape index: {}]   ;;  %s1865_s8 = inlined_call_operand.vmem [shape: f32[8,1], index: 8, kind: output, shape index: {}]  }
   0x1   :  { %v13_v0 = vstv %s1864_s7 }
   0x2   :  { %14 = vst [vmem:[#allocation5] sm:$0x1] %v13_v0 }
   0x3   :  { %15 = vsyncpa [#allocation7], 0 }
   0x4   :  { %16 = vsyncpa [#allocation9], 0 }
   0x5   :  { %17 = vsyncpa [#allocation12], 0  ;;  %s1562_s29 = smov [#allocation8]   ;;  %s1468_s11 = scalar_lea.hbm %s1858_s1, 128 }
   0x6   :  { %s35_s30 = sshll.u32 %s1562_s29, 4  ;;  %p1469_p0 = scmp.ne.s32.totalorder %s1858_s1, %s1468_s11  ;;  %s36_s30 = int_to_ptr.vmem [resolvable:$true] %s35_s30 }
   0x7   :  { %p1472_p1 = scmp.lt.u32.totalorder %s1468_s11, %s1858_s1 }
   0x9   :  { %p1474_p2 = pnand %p1472_p1, %p1469_p0 }
   0xb   :  { %1477 = shalt.err (!%p1474_p2)
}
   0xc   :  { %s1478_s7 = scalar_lea.vmem %s36_s30, 128  ;;  %p1483_p4 = scmp.lt.s32.totalorder %s36_s30, %s36_s30 }
   0xd   :  { %p1479_p3 = scmp.ne.s32.totalorder %s36_s30, %s1478_s7  ;;  %p1484_p5 = scmp.lt.s32.totalorder %s1478_s7, %s1478_s7 }
   0xf   :  { %p1485_p6 = por %p1484_p5, %p1483_p4 }
  0x11   :  { %p1486_p7 = pnand %p1485_p6, %p1479_p3 }
  0x13   :  { %1489 = shalt.err (!%p1486_p7)
}
  0x14   :  { %s1563_s16 = smov 64   ;;  %s1564_s17 = smov 4  }
  0x15   :  { %41 = dma.hbm_to_vmem [thread:$0]  %s1858_s1, 128, %s36_s30, [#allocation9], %s1563_s16, %s1563_s16, %s1564_s17  }
  0x16   :  { %s1565_s20 = smov [#allocation6]   ;;  %s1490_s24 = scalar_lea.hbm %s1857_s0, 1024 }
  0x17   :  { %s23_s21 = sshll.u32 %s1565_s20, 4  ;;  %p1491_p8 = scmp.ne.s32.totalorder %s1857_s0, %s1490_s24  ;;  %s24_s21 = int_to_ptr.vmem [resolvable:$true] %s23_s21 }
  0x18   :  { %p1494_p9 = scmp.lt.u32.totalorder %s1490_s24, %s1857_s0 }
  0x1a   :  { %p1496_p10 = pnand %p1494_p9, %p1491_p8 }
  0x1c   :  { %1499 = shalt.err (!%p1496_p10)
}
  0x1d   :  { %s1500_s29 = scalar_lea.vmem %s24_s21, 1024  ;;  %p1505_p12 = scmp.lt.s32.totalorder %s24_s21, %s24_s21 }
  0x1e   :  { %p1501_p11 = scmp.ne.s32.totalorder %s24_s21, %s1500_s29  ;;  %p1506_p13 = scmp.lt.s32.totalorder %s1500_s29, %s1500_s29 }
  0x20   :  { %p1507_p0 = por %p1506_p13, %p1505_p12 }
  0x22   :  { %p1508_p1 = pnand %p1507_p0, %p1501_p11 }
  0x24   :  { %1511 = shalt.err (!%p1508_p1)
}
  0x25   :  { %s1566_s1 = smov 128   ;;  %s1567_s30 = smov 8  }
  0x26   :  { %29 = dma.hbm_to_vmem [thread:$0]  %s1857_s0, 1024, %s24_s21, [#allocation7], %s1566_s1, %s1566_s1, %s1567_s30  }
  0x27   :  { %s1568_s11 = smov [#allocation10]   ;;  %s1569_s13 = smov [#allocation11]  }
  0x28   :  { %s49_s12 = sshll.u32 %s1568_s11, 4  ;;  %s61_s14 = sshll.u32 %s1569_s13, 4  ;;  %s50_s12 = int_to_ptr.vmem [resolvable:$true] %s49_s12  ;;  %s1653_s14 = int_to_ptr.vmem [resolvable:$true] %s61_s14 }
  0x29   :  { %s1512_s18 = scalar_lea.hbm %s1860_s3, 256 }
  0x2a   :  { %p1513_p2 = scmp.ne.s32.totalorder %s1860_s3, %s1512_s18  ;;  %p1516_p3 = scmp.lt.u32.totalorder %s1512_s18, %s1860_s3 }
  0x2c   :  { %p1518_p4 = pnand %p1516_p3, %p1513_p2 }
  0x2e   :  { %1521 = shalt.err (!%p1518_p4)
}
  0x2f   :  { %s1522_s0 = scalar_lea.vmem %s50_s12, 256  ;;  %p1527_p6 = scmp.lt.s32.totalorder %s50_s12, %s50_s12 }
  0x30   :  { %p1523_p5 = scmp.ne.s32.totalorder %s50_s12, %s1522_s0  ;;  %p1528_p7 = scmp.lt.s32.totalorder %s1522_s0, %s1522_s0 }
  0x32   :  { %p1529_p8 = por %p1528_p7, %p1527_p6 }
  0x34   :  { %p1530_p9 = pnand %p1529_p8, %p1523_p5 }
  0x36   :  { %1533 = shalt.err (!%p1530_p9)
}
  0x37   :  { %55 = dma.hbm_to_vmem [thread:$0]  %s1860_s3, 256, %s50_s12, [#allocation9], %s1563_s16, %s1563_s16, %s1564_s17  }
  0x38   :  { %s1534_s27 = scalar_lea.hbm %s1861_s4, 512 }
  0x39   :  { %p1535_p10 = scmp.ne.s32.totalorder %s1861_s4, %s1534_s27  ;;  %p1538_p11 = scmp.lt.u32.totalorder %s1534_s27, %s1861_s4 }
  0x3b   :  { %p1540_p12 = pnand %p1538_p11, %p1535_p10 }
  0x3d   :  { %1543 = shalt.err (!%p1540_p12)
}
  0x3e   :  { %s1544_s11 = scalar_lea.vmem %s1653_s14, 512  ;;  %p1549_p0 = scmp.lt.s32.totalorder %s1653_s14, %s1653_s14 }
  0x3f   :  { %p1545_p13 = scmp.ne.s32.totalorder %s1653_s14, %s1544_s11  ;;  %p1550_p1 = scmp.lt.s32.totalorder %s1544_s11, %s1544_s11 }
  0x41   :  { %p1551_p2 = por %p1550_p1, %p1549_p0 }
  0x43   :  { %p1552_p3 = pnand %p1551_p2, %p1545_p13 }
  0x45   :  { %1555 = shalt.err (!%p1552_p3)
}
  0x46   :  { %67 = dma.hbm_to_vmem [thread:$0]  %s1861_s4, 512, %s1653_s14, [#allocation12], %s1566_s1, %s1566_s1, %s1567_s30  }
  0x47   :  { %1556 = dma.done.wait [#allocation7], 1024  }
  0x48   :  { %1557 = vsyncadd [#allocation7], 4294966272 }
  0x49   :  { %1558 = dma.done.wait [#allocation9], 384  }
  0x4a   :  { %1559 = vsyncadd [#allocation9], 4294966912 }
  0x4b   :  { %1560 = dma.done.wait [#allocation12], 512  }
  0x4c   :  { %1561 = vsyncadd [#allocation12], 4294966784  ;;  %vm91_vm0 = vcmask 261120   ;;  %v1570_v1 = vmov 0.0   ;;  %vm1571_vm1 = vmmov 0   ;;  %v1700_v2 = vld [vmem:[#allocation8] sm:$0xff]  }
  0x4d   :  { %1251 = vmatprep.subr.bf16.mxu0 %v1570_v1  ;;  %1253 = vmatprep.mubr.msk.bf16.mxu0 %vm1571_vm1, %v1570_v1  ;;  %92 = vst.msk [vmem:[#allocation3] sm:$0xff] %vm91_vm0, %v1570_v1  ;;  %93 = vst.msk [vmem:[#allocation4] sm:$0xff] %vm91_vm0, %v1570_v1  ;;  %v97_v3 = vld [vmem:[#allocation6] sm:$0xff]  ;;  %vm125_vm2 = vcmask 130048   ;;  %v99_v5 = vld [vmem:[#allocation6 + $0x10] sm:$0xff]  ;;  %s1572_s30 = smov 32  }
  0x4e   :  { %1257 = vmatprep.subr.bf16.mxu1 %v1570_v1  ;;  %1259 = vmatprep.mubr.msk.bf16.mxu1 %vm1571_vm1, %v1570_v1  ;;  %v105_v4 = vpack.c.bf16 %v97_v3, %v97_v3  ;;  %v107_v6 = vpack.c.bf16 %v99_v5, %v99_v5  ;;  %v101_v7 = vld [vmem:[#allocation6 + $0x20] sm:$0xff]  ;;  %v103_v9 = vld [vmem:[#allocation6 + $0x30] sm:$0xff]  ;;  %v1721_v11 = vld [vmem:[#allocation10] sm:$0xff]   ;;  %vm1173_vm3 = vcmask 7168  }
  0x4f   :  { %1252 = vmatpush3.bf16.msra.mxu0 %v1700_v2  ;;  %1258 = vmatpush3.bf16.msra.mxu1 %v1700_v2  ;;  %v109_v8 = vpack.c.bf16 %v101_v7, %v101_v7  ;;  %v111_v10 = vpack.c.bf16 %v103_v9, %v103_v9  ;;  %v1725_v12 = vld [vmem:[#allocation10 + $0x8] sm:$0xff]   ;;  %v1742_v15 = vld [vmem:[%s1859_s2] ss:$0 sm:$0xff]  ;;  %v100_v33 = vld [vmem:[#allocation6 + $0x18] sm:$0xff]  ;;  %s1574_s2 = smov 96  }
  0x50   :  { %1263 = vmatprep.subr.bf16.mxu0 %v1570_v1  ;;  %1269 = vmatprep.subr.bf16.mxu1 %v1570_v1  ;;  %v98_v31 = vld [vmem:[#allocation6 + $0x8] sm:$0xff]  ;;  %v108_v34 = vpack.c.bf16 %v100_v33, %v100_v33  ;;  %v104_v38 = vld [vmem:[#allocation6 + $0x38] sm:$0xff] }
  0x51   :  { %v106_v32 = vpack.c.bf16 %v98_v31, %v98_v31  ;;  %v102_v36 = vld [vmem:[#allocation6 + $0x28] sm:$0xff]  ;;  %v112_v39 = vpack.c.bf16 %v104_v38, %v104_v38 }
  0x52   :  { %1254 = vmatmul.mubr.msk.bf16.vlgmr.msra.gmra.mrb[0].mxu0 %vm125_vm2, %v105_v4  ;;  %v110_v37 = vpack.c.bf16 %v102_v36, %v102_v36 }
  0x53   :  { %1264 = vmatpush3.bf16.msra.mxu0 %v1700_v2  ;;  %1265 = vmatprep.mubr.msk.bf16.mxu0 %vm1571_vm1, %v1570_v1 }
  0x54   :  { %1275 = vmatprep.subr.bf16.mxu0 %v1570_v1  ;;  %v489_v13 = vld [vmem:[#allocation3] sm:$0xff]  ;;  %v490_v22 = vld [vmem:[#allocation4] sm:$0xff]  ;;  %1260 = vmatmul.mubr.msk.bf16.vlgmr.msra.gmra.mrb[0].mxu1 %vm125_vm2, %v106_v32 }
  0x55   :  { %v492_v14 = vpack.c.bf16 %v489_v13, %v489_v13  ;;  %1270 = vmatpush3.bf16.msra.mxu1 %v1700_v2  ;;  %1271 = vmatprep.mubr.msk.bf16.mxu1 %vm1571_vm1, %v1570_v1 }
  0x56   :  { %1281 = vmatprep.subr.bf16.mxu1 %v1570_v1 }
  0x5a   :  { %1266 = vmatmul.mubr.msk.bf16.vlgmr.msra.gmra.mrb[4].mxu0 %vm125_vm2, %v107_v6 }
  0x5b   :  { %1276 = vmatpush3.bf16.msra.mxu0 %v1700_v2  ;;  %1277 = vmatprep.mubr.msk.bf16.mxu0 %vm1571_vm1, %v1570_v1 }
  0x5c   :  { %1287 = vmatprep.subr.bf16.mxu0 %v1570_v1  ;;  %1272 = vmatmul.mubr.msk.bf16.vlgmr.msra.gmra.mrb[4].mxu1 %vm125_vm2, %v108_v34 }
  0x5d   :  { %1282 = vmatpush3.bf16.msra.mxu1 %v1700_v2  ;;  %1283 = vmatprep.mubr.msk.bf16.mxu1 %vm1571_vm1, %v1570_v1 }
  0x5e   :  { %1293 = vmatprep.subr.bf16.mxu1 %v1570_v1 }
  0x62   :  { %1278 = vmatmul.mubr.msk.bf16.vlgmr.msra.gmra.mrb[8].mxu0 %vm125_vm2, %v109_v8 }
  0x63   :  { %1288 = vmatpush3.bf16.msra.mxu0 %v1700_v2  ;;  %1289 = vmatprep.mubr.msk.bf16.mxu0 %vm1571_vm1, %v1570_v1 }
  0x64   :  { %1299 = vmatprep.subr.bf16.mxu0 %v1570_v1  ;;  %1284 = vmatmul.mubr.msk.bf16.vlgmr.msra.gmra.mrb[8].mxu1 %vm125_vm2, %v110_v37 }
  0x65   :  { %1294 = vmatpush3.bf16.msra.mxu1 %v1700_v2  ;;  %1295 = vmatprep.mubr.msk.bf16.mxu1 %vm1571_vm1, %v1570_v1 }
  0x66   :  { %1307 = vmatprep.subr.bf16.mxu1 %v1570_v1 }
  0x6a   :  { %1290 = vmatmul.mubr.msk.bf16.vlgmr.msra.gmra.mrb[12].mxu0 %vm125_vm2, %v111_v10 }
  0x6b   :  { %1300 = vmatpush3.bf16.msra.mxu0 %v1721_v11  ;;  %1303 = vmatprep.mubr.msk.bf16.mxu0 %vm1571_vm1, %v1570_v1 }
  0x6c   :  { %1301 = vmatprep.subr.bf16.mxu0 %v1570_v1  ;;  %1296 = vmatmul.mubr.msk.bf16.vlgmr.msra.gmra.mrb[12].mxu1 %vm125_vm2, %v112_v39 }
  0x6d   :  { %1308 = vmatpush3.bf16.msra.mxu1 %v1721_v11  ;;  %1311 = vmatprep.mubr.msk.bf16.mxu1 %vm1571_vm1, %v1570_v1 }
  0x6e   :  { %1309 = vmatprep.subr.bf16.mxu1 %v1570_v1 }
  0x6f   :  { %1302 = vmatpush3.bf16.msra.mxu0 %v1725_v12 }
  0x70   :  { %1315 = vmatprep.subr.bf16.mxu0 %v1570_v1 }
  0x71   :  { %1310 = vmatpush3.bf16.msra.mxu1 %v1725_v12 }
  0x72   :  { %1304 = vmatmul.mubr.msk.bf16.vlgmr.msra.gmra.mrb[0].mxu0 %vm91_vm0, %v492_v14  ;;  %1323 = vmatprep.subr.bf16.mxu1 %v1570_v1 }
  0x73   :  { %1316 = vmatpush3.bf16.msra.mxu0 %v1721_v11  ;;  %1319 = vmatprep.mubr.msk.bf16.mxu0 %vm1571_vm1, %v1570_v1 }
  0x74   :  { %1317 = vmatprep.subr.bf16.mxu0 %v1570_v1 }
  0x77   :  { %1318 = vmatpush3.bf16.msra.mxu0 %v1725_v12 }
  0x78   :  { %1331 = vmatprep.subr.bf16.mxu0 %v1570_v1 }
 0x145   :  { %v543_v16 = vpop.f32.mrb[0].mxu0 }
 0x146   :  { %v1380_v17 = vadd.f32 %v1742_v15, %v543_v16  ;;  %v1305_v18 = vpop.f32.mrb[1].mxu0 }
 0x147   :  { %v546_v19 = vpop.f32.mrb[2].mxu0 }
 0x148   :  { %1436 = vtanh.f32 %v1380_v17  ;;  %v1306_v20 = vpop.f32.mrb[3].mxu0 }
 0x152   :  { %v1437_v21 = vpop.eup %1436 }
 0x153   :  { %559 = vrot.lane.b32.xlu0 %v1437_v21, %s1563_s16  ;;  %v551_v23 = vmul.f32 0.5, %v1437_v21 }
 0x155   :  { %v552_v24 = vadd.f32 0.5, %v551_v23 }
 0x157   :  { %554 = vrot.lane.b32.xlu0 %v490_v22, %s1572_s30 }
 0x1c5   :  { %v560_v25 = vpop.permute.xlu0 %559 }
 0x1c6   :  { %v562_v26 = vmul.f32 %v560_v25, %v552_v24 }
 0x1c8   :  { %564 = vrot.lane.b32.xlu1 %v562_v26, %s1572_s30 }
 0x1c9   :  { %v555_v27 = vpop.permute.xlu0 %554 }
 0x1ca   :  { %v557_v28 = vmul.f32 %v555_v27, %v552_v24 }
 0x23a   :  { %v565_v29 = vpop.permute.xlu1 %564 }
 0x23b   :  { %v567_v30 = vadd.f32 %v565_v29, %v557_v28 }
 0x23d   :  { %1438 = vtanh.f32 %v567_v30 }
 0x247   :  { %v1439_v35 = vpop.eup %1438 }
 0x248   :  { %570 = vrot.lane.b32.xlu1 %v1439_v35, %s1563_s16 }
 0x2ba   :  { %v571_v40 = vpop.permute.xlu1 %570 }
 0x2bb   :  { %v573_v41 = vmul.f32 %v571_v40, %v552_v24 }
 0x2bd   :  { %v575_v42 = vpack.c.bf16 %v573_v41, %v573_v41 }
 0x2bf   :  { %577 = vrot.lane.b32.xlu0 %v575_v42, %s1572_s30 }
 0x331   :  { %v578_v43 = vpop.permute.xlu0 %577 }
 0x332   :  { %1312 = vmatmul.mubr.msk.bf16.vlgmr.msra.gmra.mrb[0].mxu1 %vm91_vm0, %v578_v43 }
 0x333   :  { %1324 = vmatpush3.bf16.msra.mxu1 %v1721_v11  ;;  %1327 = vmatprep.mubr.msk.bf16.mxu1 %vm1571_vm1, %v1570_v1 }
 0x334   :  { %1325 = vmatprep.subr.bf16.mxu1 %v1570_v1 }
 0x337   :  { %1326 = vmatpush3.bf16.msra.mxu1 %v1725_v12 }
 0x338   :  { %1339 = vmatprep.subr.bf16.mxu1 %v1570_v1 }
 0x405   :  { %v616_v44 = vpop.f32.mrb[0].mxu1 }
 0x406   :  { %v1381_v45 = vadd.f32 %v1742_v15, %v616_v44  ;;  %v1313_v46 = vpop.f32.mrb[1].mxu1 }
 0x407   :  { %v619_v47 = vpop.f32.mrb[2].mxu1 }
 0x408   :  { %1440 = vtanh.f32 %v1381_v45  ;;  %v1314_v48 = vpop.f32.mrb[3].mxu1 }
 0x412   :  { %v1441_v49 = vpop.eup %1440 }
 0x413   :  { %628 = vrot.lane.b32.xlu1 %v1441_v49, %s1563_s16  ;;  %v624_v50 = vmul.f32 0.5, %v1441_v49 }
 0x415   :  { %v625_v51 = vadd.f32 0.5, %v624_v50 }
 0x417   :  { %v626_v54 = vmul.f32 %v625_v51, %v567_v30 }
 0x485   :  { %v629_v52 = vpop.permute.xlu1 %628 }
 0x486   :  { %v631_v53 = vmul.f32 %v629_v52, %v625_v51 }
 0x488   :  { %633 = vrot.lane.b32.xlu0 %v631_v53, %s1572_s30 }
 0x4fa   :  { %v634_v55 = vpop.permute.xlu0 %633 }
 0x4fb   :  { %v636_v56 = vadd.f32 %v634_v55, %v626_v54 }
 0x4fd   :  { %1442 = vtanh.f32 %v636_v56 }
 0x507   :  { %v1443_v57 = vpop.eup %1442 }
 0x508   :  { %639 = vrot.lane.b32.xlu1 %v1443_v57, %s1563_s16 }
 0x57a   :  { %v640_v58 = vpop.permute.xlu1 %639 }
 0x57b   :  { %v642_v59 = vmul.f32 %v640_v58, %v625_v51 }
 0x57d   :  { %v644_v60 = vpack.c.bf16 %v642_v59, %v642_v59 }
 0x57f   :  { %646 = vrot.lane.b32.xlu0 %v644_v60, %s1572_s30 }
 0x5f1   :  { %v647_v61 = vpop.permute.xlu0 %646 }
 0x5f2   :  { %1320 = vmatmul.mubr.msk.bf16.vlgmr.msra.gmra.mrb[4].mxu0 %vm91_vm0, %v647_v61 }
 0x5f3   :  { %1332 = vmatpush3.bf16.msra.mxu0 %v1721_v11  ;;  %1335 = vmatprep.mubr.msk.bf16.mxu0 %vm1571_vm1, %v1570_v1 }
 0x5f4   :  { %1333 = vmatprep.subr.bf16.mxu0 %v1570_v1 }
 0x5f7   :  { %1334 = vmatpush3.bf16.msra.mxu0 %v1725_v12 }
 0x5f8   :  { %1347 = vmatprep.subr.bf16.mxu0 %v1570_v1 }
 0x6c5   :  { %v685_v62 = vpop.f32.mrb[4].mxu0 }
 0x6c6   :  { %v1382_v63 = vadd.f32 %v1742_v15, %v685_v62  ;;  %v1321_v0 = vpop.f32.mrb[5].mxu0 }
 0x6c7   :  { %v688_v2 = vpop.f32.mrb[6].mxu0 }
 0x6c8   :  { %1444 = vtanh.f32 %v1382_v63  ;;  %v1322_v3 = vpop.f32.mrb[7].mxu0 }
 0x6d2   :  { %v1445_v4 = vpop.eup %1444 }
 0x6d3   :  { %697 = vrot.lane.b32.xlu1 %v1445_v4, %s1563_s16  ;;  %v693_v5 = vmul.f32 0.5, %v1445_v4 }
 0x6d5   :  { %v694_v6 = vadd.f32 0.5, %v693_v5 }
 0x6d7   :  { %v695_v9 = vmul.f32 %v694_v6, %v636_v56 }
 0x745   :  { %v698_v7 = vpop.permute.xlu1 %697 }
 0x746   :  { %v700_v8 = vmul.f32 %v698_v7, %v694_v6 }
 0x748   :  { %702 = vrot.lane.b32.xlu0 %v700_v8, %s1572_s30 }
 0x7ba   :  { %v703_v10 = vpop.permute.xlu0 %702 }
 0x7bb   :  { %v705_v13 = vadd.f32 %v703_v10, %v695_v9 }
 0x7bd   :  { %1446 = vtanh.f32 %v705_v13 }
 0x7c7   :  { %v1447_v14 = vpop.eup %1446 }
 0x7c8   :  { %708 = vrot.lane.b32.xlu1 %v1447_v14, %s1563_s16 }
 0x83a   :  { %v709_v16 = vpop.permute.xlu1 %708 }
 0x83b   :  { %v711_v17 = vmul.f32 %v709_v16, %v694_v6 }
 0x83d   :  { %v713_v18 = vpack.c.bf16 %v711_v17, %v711_v17 }
 0x83f   :  { %715 = vrot.lane.b32.xlu0 %v713_v18, %s1572_s30 }
 0x8b1   :  { %v716_v19 = vpop.permute.xlu0 %715 }
 0x8b2   :  { %1328 = vmatmul.mubr.msk.bf16.vlgmr.msra.gmra.mrb[4].mxu1 %vm91_vm0, %v716_v19 }
 0x8b3   :  { %1340 = vmatpush3.bf16.msra.mxu1 %v1721_v11  ;;  %1343 = vmatprep.mubr.msk.bf16.mxu1 %vm1571_vm1, %v1570_v1 }
 0x8b4   :  { %1341 = vmatprep.subr.bf16.mxu1 %v1570_v1 }
 0x8b7   :  { %1342 = vmatpush3.bf16.msra.mxu1 %v1725_v12 }
 0x8b8   :  { %1355 = vmatprep.subr.bf16.mxu1 %v1570_v1 }
 0x985   :  { %v754_v20 = vpop.f32.mrb[4].mxu1 }
 0x986   :  { %v1383_v21 = vadd.f32 %v1742_v15, %v754_v20  ;;  %v1329_v22 = vpop.f32.mrb[5].mxu1 }
 0x987   :  { %v757_v23 = vpop.f32.mrb[6].mxu1 }
 0x988   :  { %1448 = vtanh.f32 %v1383_v21  ;;  %v1330_v24 = vpop.f32.mrb[7].mxu1 }
 0x992   :  { %v1449_v25 = vpop.eup %1448 }
 0x993   :  { %766 = vrot.lane.b32.xlu1 %v1449_v25, %s1563_s16  ;;  %v762_v26 = vmul.f32 0.5, %v1449_v25 }
 0x995   :  { %v763_v27 = vadd.f32 0.5, %v762_v26 }
 0x997   :  { %v764_v30 = vmul.f32 %v763_v27, %v705_v13 }
 0xa05   :  { %v767_v28 = vpop.permute.xlu1 %766 }
 0xa06   :  { %v769_v29 = vmul.f32 %v767_v28, %v763_v27 }
 0xa08   :  { %771 = vrot.lane.b32.xlu0 %v769_v29, %s1572_s30 }
 0xa7a   :  { %v772_v31 = vpop.permute.xlu0 %771 }
 0xa7b   :  { %v774_v32 = vadd.f32 %v772_v31, %v764_v30 }
 0xa7d   :  { %1450 = vtanh.f32 %v774_v32 }
 0xa87   :  { %v1451_v33 = vpop.eup %1450 }
 0xa88   :  { %777 = vrot.lane.b32.xlu1 %v1451_v33, %s1563_s16 }
 0xafa   :  { %v778_v34 = vpop.permute.xlu1 %777 }
 0xafb   :  { %v780_v35 = vmul.f32 %v778_v34, %v763_v27 }
 0xafd   :  { %v782_v36 = vpack.c.bf16 %v780_v35, %v780_v35 }
 0xaff   :  { %784 = vrot.lane.b32.xlu0 %v782_v36, %s1572_s30 }
 0xb71   :  { %v785_v37 = vpop.permute.xlu0 %784 }
 0xb72   :  { %1336 = vmatmul.mubr.msk.bf16.vlgmr.msra.gmra.mrb[8].mxu0 %vm91_vm0, %v785_v37 }
 0xb73   :  { %1348 = vmatpush3.bf16.msra.mxu0 %v1721_v11  ;;  %1351 = vmatprep.mubr.msk.bf16.mxu0 %vm1571_vm1, %v1570_v1 }
 0xb74   :  { %1349 = vmatprep.subr.bf16.mxu0 %v1570_v1 }
 0xb77   :  { %1350 = vmatpush3.bf16.msra.mxu0 %v1725_v12 }
 0xc45   :  { %v823_v38 = vpop.f32.mrb[8].mxu0 }
 0xc46   :  { %v1384_v39 = vadd.f32 %v1742_v15, %v823_v38  ;;  %v1337_v40 = vpop.f32.mrb[9].mxu0 }
 0xc47   :  { %v826_v41 = vpop.f32.mrb[10].mxu0 }
 0xc48   :  { %1452 = vtanh.f32 %v1384_v39  ;;  %v1338_v42 = vpop.f32.mrb[11].mxu0 }
 0xc49   :  { %v1070_v42 = vld [vmem:[#allocation11] sm:$0xff] }
 0xc52   :  { %v1453_v43 = vpop.eup %1452 }
 0xc53   :  { %835 = vrot.lane.b32.xlu1 %v1453_v43, %s1563_s16  ;;  %v831_v44 = vmul.f32 0.5, %v1453_v43  ;;  %v1071_v43 = vld [vmem:[#allocation11 + $0x8] sm:$0xff] }
 0xc55   :  { %v832_v45 = vadd.f32 0.5, %v831_v44  ;;  %v1573_v44 = vmov 0.0|0.0  }
 0xc56   :  { %1374 = vmatprep.subr.bf16.mxu0 %v1573_v44 }
 0xc57   :  { %v833_v48 = vmul.f32 %v832_v45, %v774_v32 }
 0xcc5   :  { %v836_v46 = vpop.permute.xlu1 %835 }
 0xcc6   :  { %v838_v47 = vmul.f32 %v836_v46, %v832_v45  ;;  %v1073_v46 = vld [vmem:[#allocation11 + $0x18] sm:$0xff] }
 0xcc8   :  { %840 = vrot.lane.b32.xlu0 %v838_v47, %s1572_s30 }
 0xd3a   :  { %v841_v49 = vpop.permute.xlu0 %840 }
 0xd3b   :  { %v843_v50 = vadd.f32 %v841_v49, %v833_v48 }
 0xd3d   :  { %1454 = vtanh.f32 %v843_v50 }
 0xd47   :  { %v1455_v51 = vpop.eup %1454 }
 0xd48   :  { %846 = vrot.lane.b32.xlu1 %v1455_v51, %s1563_s16 }
 0xdba   :  { %v847_v52 = vpop.permute.xlu1 %846 }
 0xdbb   :  { %v849_v53 = vmul.f32 %v847_v52, %v832_v45  ;;  %v1375_v45 = vpack.c.bf16 %v1071_v43, %v1070_v42 }
 0xdbd   :  { %v851_v54 = vpack.c.bf16 %v849_v53, %v849_v53  ;;  %v1202_v53 = vld [vmem:[%s1862_s5] ss:$0 sm:$0xff] }
 0xdbf   :  { %853 = vrot.lane.b32.xlu0 %v851_v54, %s1572_s30 }
 0xe31   :  { %v854_v55 = vpop.permute.xlu0 %853 }
 0xe32   :  { %1344 = vmatmul.mubr.msk.bf16.vlgmr.msra.gmra.mrb[8].mxu1 %vm91_vm0, %v854_v55 }
 0xe33   :  { %1356 = vmatpush3.bf16.msra.mxu1 %v1721_v11  ;;  %1359 = vmatprep.mubr.msk.bf16.mxu1 %vm1571_vm1, %v1570_v1 }
 0xe34   :  { %1357 = vmatprep.subr.bf16.mxu1 %v1570_v1 }
 0xe37   :  { %1358 = vmatpush3.bf16.msra.mxu1 %v1725_v12 }
 0xf05   :  { %v892_v56 = vpop.f32.mrb[8].mxu1 }
 0xf06   :  { %v1385_v57 = vadd.f32 %v1742_v15, %v892_v56  ;;  %v1345_v58 = vpop.f32.mrb[9].mxu1 }
 0xf07   :  { %v895_v59 = vpop.f32.mrb[10].mxu1 }
 0xf08   :  { %1456 = vtanh.f32 %v1385_v57  ;;  %v1346_v60 = vpop.f32.mrb[11].mxu1  ;;  %v1204_v57 = vld [vmem:[%s1863_s6] ss:$0 sm:$0xff] }
 0xf12   :  { %v1457_v61 = vpop.eup %1456 }
 0xf13   :  { %904 = vrot.lane.b32.xlu1 %v1457_v61, %s1563_s16  ;;  %v900_v62 = vmul.f32 0.5, %v1457_v61  ;;  %v1205_v61 = vld [vmem:[#allocation5] ss:$0 sm:$0xff] }
 0xf15   :  { %v901_v63 = vadd.f32 0.5, %v900_v62 }
 0xf17   :  { %v902_v2 = vmul.f32 %v901_v63, %v843_v50 }
 0xf85   :  { %v905_v11 = vpop.permute.xlu1 %904 }
 0xf86   :  { %v907_v0 = vmul.f32 %v905_v11, %v901_v63 }
 0xf88   :  { %909 = vrot.lane.b32.xlu0 %v907_v0, %s1572_s30 }
 0xffa   :  { %v910_v3 = vpop.permute.xlu0 %909 }
 0xffb   :  { %v912_v4 = vadd.f32 %v910_v3, %v902_v2 }
 0xffd   :  { %1458 = vtanh.f32 %v912_v4 }
0x1007   :  { %v1459_v12 = vpop.eup %1458 }
0x1008   :  { %915 = vrot.lane.b32.xlu1 %v1459_v12, %s1563_s16 }
0x107a   :  { %v916_v5 = vpop.permute.xlu1 %915 }
0x107b   :  { %v918_v6 = vmul.f32 %v916_v5, %v901_v63 }
0x107d   :  { %v920_v7 = vpack.c.bf16 %v918_v6, %v918_v6 }
0x107f   :  { %922 = vrot.lane.b32.xlu0 %v920_v7, %s1572_s30 }
0x10f1   :  { %v923_v8 = vpop.permute.xlu0 %922 }
0x10f2   :  { %1352 = vmatmul.mubr.msk.bf16.vlgmr.msra.gmra.mrb[12].mxu0 %vm91_vm0, %v923_v8 }
0x10f3   :  { %1371 = vmatprep.mubr.msk.f32.mxu0 %vm1571_vm1, %v1570_v1  ;;  %1376 = vmatpush3.bf16.msra.mxu0 %v1375_v45 }
0x10f4   :  { %1377 = vmatprep.subr.bf16.mxu0 %v1573_v44 }
0x11c5   :  { %v961_v9 = vpop.f32.mrb[12].mxu0 }
0x11c6   :  { %v1386_v10 = vadd.f32 %v1742_v15, %v961_v9  ;;  %v1353_v13 = vpop.f32.mrb[13].mxu0 }
0x11c7   :  { %v964_v14 = vpop.f32.mrb[14].mxu0 }
0x11c8   :  { %1460 = vtanh.f32 %v1386_v10  ;;  %v1354_v16 = vpop.f32.mrb[15].mxu0 }
0x11d2   :  { %v1461_v17 = vpop.eup %1460 }
0x11d3   :  { %973 = vrot.lane.b32.xlu1 %v1461_v17, %s1563_s16  ;;  %v969_v18 = vmul.f32 0.5, %v1461_v17 }
0x11d5   :  { %v970_v19 = vadd.f32 0.5, %v969_v18 }
0x11d7   :  { %v971_v22 = vmul.f32 %v970_v19, %v912_v4 }
0x1245   :  { %v974_v20 = vpop.permute.xlu1 %973 }
0x1246   :  { %v976_v21 = vmul.f32 %v974_v20, %v970_v19 }
0x1248   :  { %978 = vrot.lane.b32.xlu0 %v976_v21, %s1572_s30 }
0x12ba   :  { %v979_v23 = vpop.permute.xlu0 %978 }
0x12bb   :  { %v981_v24 = vadd.f32 %v979_v23, %v971_v22 }
0x12bd   :  { %1462 = vtanh.f32 %v981_v24 }
0x12c7   :  { %v1463_v1 = vpop.eup %1462 }
0x12c8   :  { %984 = vrot.lane.b32.xlu1 %v1463_v1, %s1563_s16 }
0x133a   :  { %v985_v25 = vpop.permute.xlu1 %984 }
0x133b   :  { %v987_v26 = vmul.f32 %v985_v25, %v970_v19 }
0x133d   :  { %v989_v27 = vpack.c.bf16 %v987_v26, %v987_v26 }
0x133f   :  { %991 = vrot.lane.b32.xlu0 %v989_v27, %s1572_s30 }
0x13b1   :  { %v992_v28 = vpop.permute.xlu0 %991 }
0x13b2   :  { %1360 = vmatmul.mubr.msk.bf16.vlgmr.msra.gmra.mrb[12].mxu1 %vm91_vm0, %v992_v28 }
0x1485   :  { %v1030_v29 = vpop.f32.mrb[12].mxu1 }
0x1486   :  { %v1387_v30 = vadd.f32 %v1742_v15, %v1030_v29  ;;  %v1361_v31 = vpop.f32.mrb[13].mxu1  ;;  %v1072_v15 = vld [vmem:[#allocation11 + $0x10] sm:$0xff] }
0x1487   :  { %v1033_v32 = vpop.f32.mrb[14].mxu1  ;;  %v1378_v47 = vpack.c.bf16 %v1073_v46, %v1072_v15 }
0x1488   :  { %1464 = vtanh.f32 %v1387_v30  ;;  %v1362_v33 = vpop.f32.mrb[15].mxu1 }
0x1489   :  { %1379 = vmatpush3.bf16.msra.mxu0 %v1378_v47 }
0x1492   :  { %v1465_v34 = vpop.eup %1464 }
0x1493   :  { %1042 = vrot.lane.b32.xlu1 %v1465_v34, %s1563_s16  ;;  %v1038_v35 = vmul.f32 0.5, %v1465_v34 }
0x1495   :  { %v1039_v36 = vadd.f32 0.5, %v1038_v35 }
0x1497   :  { %v1040_v39 = vmul.f32 %v1039_v36, %v981_v24 }
0x1505   :  { %v1043_v37 = vpop.permute.xlu1 %1042 }
0x1506   :  { %v1045_v38 = vmul.f32 %v1043_v37, %v1039_v36 }
0x1508   :  { %1047 = vrot.lane.b32.xlu0 %v1045_v38, %s1572_s30 }
0x157a   :  { %v1048_v40 = vpop.permute.xlu0 %1047 }
0x157b   :  { %v1050_v41 = vadd.f32 %v1048_v40, %v1040_v39 }
0x157d   :  { %1466 = vtanh.f32 %v1050_v41 }
0x1587   :  { %v1467_v48 = vpop.eup %1466 }
0x1588   :  { %1053 = vrot.lane.b32.xlu1 %v1467_v48, %s1563_s16 }
0x15fa   :  { %v1054_v49 = vpop.permute.xlu1 %1053 }
0x15fb   :  { %v1056_v50 = vmul.f32 %v1054_v49, %v1039_v36 }
0x15fd   :  { %1058 = vrot.lane.b32.xlu0 %v1056_v50, %s1572_s30 }
0x1601   :  { %1063 = vrot.lane.b32.xlu0 %v1050_v41, %s1574_s2 }
0x166f   :  { %v1059_v51 = vpop.permute.xlu0 %1058 }
0x1670   :  { %1061 = vst.msk [vmem:[#allocation3] sm:$0xff] %vm91_vm0, %v1059_v51  ;;  %1372 = vmatmul.mubr.msk.f32.vlgmr.msra.gmra.mrb[16].mxu0 %vm91_vm0, %v1059_v51 }
0x1673   :  { %v1064_v52 = vpop.permute.xlu0 %1063 }
0x1674   :  { %1066 = vst.msk [vmem:[#allocation4] sm:$0xff] %vm91_vm0, %v1064_v52 }
0x1743   :  { %v1149_v54 = vpop.f32.mrb[16].mxu0 }
0x1744   :  { %v1150_v55 = vadd.f32 %v1202_v53, %v1149_v54  ;;  %v1373_v56 = vpop.f32.mrb[17].mxu0 }
0x1746   :  { %v1153_v58 = vmax.f32 %v1150_v55, 0.0 }
0x1748   :  { %v1161_v59 = vmul.f32 %v1204_v57, %v1153_v58 }
0x174a   :  { %v1162_v60 = vsel %vm91_vm0, %v1161_v59, 0.0 }
0x174b   :  { %1163 = vadd.xlane.f32.xlu1 %v1162_v60 }
0x17d8   :  { %v1164_v62 = vpop.xlane.xlu1 %1163 }
0x17d9   :  { %v1172_v63 = vadd.f32 %v1205_v61, %v1164_v62 }
0x17db   :  { %1174 = vst.msk [vmem:[%s1865_s8] sm:$0xff] %vm1173_vm3, %v1172_v63 }
0x17dc   :  { %1179 = vsyncpa [#allocation7], 1 }
0x17dd   :  { %1180 = vsyncpa [#allocation9], 1 }
0x17de   :  { %1181 = vsyncpa [#allocation12], 1 }

</bundles_post_ra>
